<compile_context>
chip_gen: v7x
topology: tpu7x:2x2x1
jax: 0.10.0
libtpu: 0.0.40
codegen_flags: <defaults>
</compile_context>

<pallas_src>
import functools

import jax
import jax.numpy as jnp
from jax import lax
from jax.experimental import pallas as pl
from jax.experimental.pallas import tpu as pltpu

EPS = 1e-5


# ------------------------------ fused kernel --------------------------------

def _bottleneck_kernel(x_ref, w1t_ref, s1_ref, b1_ref,
                       w2t_ref, s2_ref, b2_ref,
                       w3t_ref, s3_ref, b3_ref,
                       o_ref, y1p_ref,
                       *, kt, H, W, compute_dtype):
    """One grid step = one (batch, depth) output slice, shape (Cout, H*W).

    x_ref  : (1, D, Cin, S)   channel-major input, resident per batch
    w1t_ref: (width, Cin)     conv1 weight, transposed (out, in)
    w2t_ref: (kt, 3, 3, width, width)  conv2 weight per tap, (out, in)
    w3t_ref: (Cout, width)    conv3 weight, transposed (out, in)
    s*/b*  : (C, 1)           folded BatchNorm scale / bias (f32)
    o_ref  : (1, 1, Cout, S)  output block
    y1p_ref: (width, S+2W+2)  f32 scratch: flattened, zero-bordered line buffer
    """
    D = x_ref.shape[1]
    S = H * W
    width = w1t_ref.shape[0]
    pt = kt // 2
    d = pl.program_id(1)

    # ---- hoisted loads (reused across all 27 taps; never re-broadcast) ----
    w1t = w1t_ref[...]
    w3t = w3t_ref[...]
    s1 = s1_ref[...]; b1 = b1_ref[...]
    s2 = s2_ref[...]; b2 = b2_ref[...]
    s3 = s3_ref[...]; b3 = b3_ref[...]

    # Column-index masks for the W wrap-around of the flattened line buffer.
    col = lax.broadcasted_iota(jnp.int32, (1, S), 1)
    wpos = col % W
    mask_wm1 = wpos >= 1          # reading neighbour at w-1 is valid
    mask_wp1 = wpos <= (W - 2)    # reading neighbour at w+1 is valid

    # Keep the halo border of the line buffer zeroed (handles the H boundary).
    zeros_border = jnp.zeros((width, W + 1), jnp.float32)
    y1p_ref[:, 0:W + 1] = zeros_border
    y1p_ref[:, W + 1 + S:S + 2 * W + 2] = zeros_border

    def conv1_bn_relu(x_slab):
        # (Cin, S) -> (width, S), f32 epilogue.
        y = jnp.dot(w1t, x_slab, preferred_element_type=jnp.float32)
        return jnp.maximum(y * s1 + b1, 0.0)

    # Center depth slice: used both as conv1 input (tap a == pt) and residual.
    x_center = x_ref[0, pl.ds(d, 1), :, :][0]          # (Cin, S)

    acc2 = jnp.zeros((width, S), jnp.float32)
    for a in range(kt):
        dd = a - pt
        if dd == 0:
            y1 = conv1_bn_relu(x_center)
        else:
            dsrc = d + dd
            dclamped = jnp.clip(dsrc, 0, D - 1)
            x_slab = x_ref[0, pl.ds(dclamped, 1), :, :][0]
            y1 = conv1_bn_relu(x_slab)
            valid = jnp.logical_and(dsrc >= 0, dsrc < D)
            y1 = jnp.where(valid, y1, 0.0)             # depth zero-padding

        # Write the slice into the interior of the zero-bordered line buffer.
        y1p_ref[:, W + 1:W + 1 + S] = y1

        # 3x3 spatial taps = static lane-offset slices of the line buffer.
        for b in range(3):
            for c in range(3):
                start = (W + 1) + (b - 1) * W + (c - 1)
                tap = y1p_ref[:, start:start + S]      # (width, S), f32
                if c == 0:
                    tap = jnp.where(mask_wm1, tap, 0.0)
                elif c == 2:
                    tap = jnp.where(mask_wp1, tap, 0.0)
                w2_tap = w2t_ref[a, b, c]              # (width_out, width_in)
                acc2 = acc2 + jnp.dot(w2_tap, tap.astype(compute_dtype),
                                      preferred_element_type=jnp.float32)

    # bn2 + relu (f32 epilogue), conv3 + bn3 + residual + relu.
    y2 = jnp.maximum(acc2 * s2 + b2, 0.0).astype(compute_dtype)
    y3 = jnp.dot(w3t, y2, preferred_element_type=jnp.float32)
    y3 = y3 * s3 + b3
    out = jnp.maximum(y3 + x_center.astype(jnp.float32), 0.0)
    o_ref[0, 0, :, :] = out


# -------------------------------- wrapper ------------------------------------

def bottleneck_forward(x_ncdhw, p, kernel_t=3, compute_dtype=jnp.float32):
    """Pallas implementation of Bottleneck.forward (stride=1, downsample=None).

    x_ncdhw: (N, Cin, D, H, W) float32 (PyTorch NCDHW contract).
    """
    N, Cin, D, H, W = x_ncdhw.shape
    S = H * W
    width = p["w1"].shape[1]
    Cout = p["w3"].shape[1]
    assert Cin == Cout, "no-downsample Bottleneck requires inplanes == planes*4"

    # NCDHW -> (N, D, Cin, H*W): channel-major per depth slice, spatial on lanes.
    x4 = jnp.transpose(x_ncdhw, (0, 2, 1, 3, 4)).reshape(N, D, Cin, S)
    x4 = x4.astype(compute_dtype)

    # Transpose weights to (out, in) so matmul outputs are (C_out, H*W).
    w1t = p["w1"].T.astype(compute_dtype)                     # (width, Cin)
    w2t = jnp.swapaxes(p["w2"], -1, -2).astype(compute_dtype)  # (kt,3,3,out,in)
    w3t = p["w3"].T.astype(compute_dtype)                     # (Cout, width)
    s1 = p["s1"].reshape(-1, 1).astype(jnp.float32)
    b1 = p["b1"].reshape(-1, 1).astype(jnp.float32)
    s2 = p["s2"].reshape(-1, 1).astype(jnp.float32)
    b2 = p["b2"].reshape(-1, 1).astype(jnp.float32)
    s3 = p["s3"].reshape(-1, 1).astype(jnp.float32)
    b3 = p["b3"].reshape(-1, 1).astype(jnp.float32)

    def const_spec(arr):
        rank = arr.ndim
        return pl.BlockSpec(arr.shape, lambda n, d: (0,) * rank)

    kernel = functools.partial(_bottleneck_kernel, kt=kernel_t, H=H, W=W,
                               compute_dtype=compute_dtype)

    out4 = pl.pallas_call(
        kernel,
        out_shape=jax.ShapeDtypeStruct((N, D, Cout, S), jnp.float32),
        grid=(N, D),
        in_specs=[
            # input slab: resident per batch, re-fetched only when n changes
            pl.BlockSpec((1, D, Cin, S), lambda n, d: (n, 0, 0, 0)),
            const_spec(w1t), const_spec(s1), const_spec(b1),
            const_spec(w2t), const_spec(s2), const_spec(b2),
            const_spec(w3t), const_spec(s3), const_spec(b3),
        ],
        out_specs=pl.BlockSpec((1, 1, Cout, S), lambda n, d: (n, d, 0, 0)),
        scratch_shapes=[pltpu.VMEM((width, S + 2 * W + 2), jnp.float32)],
        compiler_params=pltpu.CompilerParams(
            dimension_semantics=("parallel", "parallel")),
    )(x4, w1t, s1, b1, w2t, s2, b2, w3t, s3, b3)

    # (N, D, Cout, H*W) -> NCDHW
    return jnp.transpose(out4.reshape(N, D, Cout, H, W), (0, 2, 1, 3, 4))


# ---------------------------- parameter setup -------------------------------

def fold_bn(gamma, beta, mean, var):
    s = gamma / jnp.sqrt(var + EPS)
    return s, beta - mean * s


def make_params(key, inplanes, planes, kernel_t=3, groups=1, base_width=64):
    width = int(planes * (base_width / 64.0)) * groups
    outp = planes * 4
    ks = jax.random.split(key, 16)

    def bn_params(k0, k1, k2, k3, c):
        gamma = jax.random.uniform(k0, (c,), jnp.float32, 0.5, 1.5)
        beta = 0.1 * jax.random.normal(k1, (c,), jnp.float32)
        mean = 0.1 * jax.random.normal(k2, (c,), jnp.float32)
        var = jax.random.uniform(k3, (c,), jnp.float32, 0.5, 1.5)
        return fold_bn(gamma, beta, mean, var)

    w1 = 0.1 * jax.random.normal(ks[0], (inplanes, width), jnp.float32)          # 1x1x1
    w2 = 0.1 * jax.random.normal(ks[1], (kernel_t, 3, 3, width, width),
                                 jnp.float32)                                     # DHWIO
    w3 = 0.1 * jax.random.normal(ks[2], (width, outp), jnp.float32)               # 1x1x1
    s1, b1 = bn_params(ks[3], ks[4], ks[5], ks[6], width)
    s2, b2 = bn_params(ks[7], ks[8], ks[9], ks[10], width)
    s3, b3 = bn_params(ks[11], ks[12], ks[13], ks[14], outp)
    return dict(w1=w1, w2=w2, w3=w3, s1=s1, b1=b1, s2=s2, b2=b2, s3=s3, b3=b3)


# ------------------------- pure-JAX reference --------------------------------

def reference_forward(x_ncdhw, p, kernel_t=3):
    x = jnp.transpose(x_ncdhw, (0, 2, 3, 4, 1))
    y = jnp.einsum("ndhwc,co->ndhwo", x, p["w1"])
    y = jnp.maximum(y * p["s1"] + p["b1"], 0.0)
    y = lax.conv_general_dilated(
        y, p["w2"], window_strides=(1, 1, 1),
        padding=[(kernel_t // 2, kernel_t // 2), (1, 1), (1, 1)],
        dimension_numbers=("NDHWC", "DHWIO", "NDHWC"))
    y = jnp.maximum(y * p["s2"] + p["b2"], 0.0)
    y = jnp.einsum("ndhwc,co->ndhwo", y, p["w3"])
    y = y * p["s3"] + p["b3"]
    y = jnp.maximum(y + x, 0.0)
    return jnp.transpose(y, (0, 4, 1, 2, 3))


# --------------------------------- main --------------------------------------

if __name__ == "__main__":
    # Bottleneck(inplanes=16, planes=4, stride=1, kernel=3, downsample=None)
    # -> width=4, output channels = planes*4 = 16 (matches residual).
    inplanes, planes, kernel_t = 16, 4, 3
    N, D, H, W = 2, 4, 8, 8

    key = jax.random.PRNGKey(0)
    kx, kp = jax.random.split(key)
    x = jax.random.normal(kx, (N, inplanes, D, H, W), jnp.float32)  # NCDHW
    params = make_params(kp, inplanes, planes, kernel_t)

    ref = jax.block_until_ready(reference_forward(x, params, kernel_t))

    # f32 path (tight correctness check vs f32 reference).
    out = jax.block_until_ready(bottleneck_forward(x, params, kernel_t))
    assert out.shape == (N, planes * 4, D, H, W)
    assert jnp.allclose(out, ref, atol=1e-3, rtol=1e-3), "f32 mismatch vs reference"

    # bf16 compute path (MXU operands bf16, f32 accumulation / epilogue).
    out_bf16 = jax.block_until_ready(
        bottleneck_forward(x, params, kernel_t, compute_dtype=jnp.bfloat16))
    assert jnp.allclose(out_bf16, ref, atol=2e-1, rtol=2e-1), "bf16 mismatch vs reference"

    print("KERNEL_OK")
</pallas_src>

<mosaic_0001>
module attributes {stable_mosaic.version = 11 : i64} {
  func.func @_bottleneck_kernel(%arg0: i32, %arg1: i32, %arg2: memref<1x4x16x64xf32, #tpu.memory_space<vmem>>, %arg3: memref<4x16xf32, #tpu.memory_space<vmem>>, %arg4: memref<4x1xf32, #tpu.memory_space<vmem>>, %arg5: memref<4x1xf32, #tpu.memory_space<vmem>>, %arg6: memref<3x3x3x4x4xf32, #tpu.memory_space<vmem>>, %arg7: memref<4x1xf32, #tpu.memory_space<vmem>>, %arg8: memref<4x1xf32, #tpu.memory_space<vmem>>, %arg9: memref<16x4xf32, #tpu.memory_space<vmem>>, %arg10: memref<16x1xf32, #tpu.memory_space<vmem>>, %arg11: memref<16x1xf32, #tpu.memory_space<vmem>>, %arg12: memref<1x1x16x64xf32, #tpu.memory_space<vmem>>, %arg13: memref<4x82xf32, #tpu.memory_space<vmem>>) attributes {dimension_semantics = [#tpu.dimension_semantics<parallel>, #tpu.dimension_semantics<parallel>], iteration_bounds = array<i64: 2, 4>, scalar_prefetch = 0 : i64, scratch_operands = 1 : i64, tpu.core_type = #tpu.core_type<tc>, window_params = [{transform_indices = @transform_0, window_bounds = array<i64: 1, 4, 16, 64>}, {pipeline_mode = #tpu.pipeline_mode<synchronous>, transform_indices = @transform_1, window_bounds = array<i64: 4, 16>}, {pipeline_mode = #tpu.pipeline_mode<synchronous>, transform_indices = @transform_2, window_bounds = array<i64: 4, 1>}, {pipeline_mode = #tpu.pipeline_mode<synchronous>, transform_indices = @transform_3, window_bounds = array<i64: 4, 1>}, {pipeline_mode = #tpu.pipeline_mode<synchronous>, transform_indices = @transform_4, window_bounds = array<i64: 3, 3, 3, 4, 4>}, {pipeline_mode = #tpu.pipeline_mode<synchronous>, transform_indices = @transform_5, window_bounds = array<i64: 4, 1>}, {pipeline_mode = #tpu.pipeline_mode<synchronous>, transform_indices = @transform_6, window_bounds = array<i64: 4, 1>}, {pipeline_mode = #tpu.pipeline_mode<synchronous>, transform_indices = @transform_7, window_bounds = array<i64: 16, 4>}, {pipeline_mode = #tpu.pipeline_mode<synchronous>, transform_indices = @transform_8, window_bounds = array<i64: 16, 1>}, {pipeline_mode = #tpu.pipeline_mode<synchronous>, transform_indices = @transform_9, window_bounds = array<i64: 16, 1>}, {transform_indices = @transform_10, window_bounds = array<i64: 1, 1, 16, 64>}]} {
    %c0 = arith.constant 0 : index
    %c0_0 = arith.constant 0 : index
    %0 = vector.load %arg3[%c0, %c0_0] : memref<4x16xf32, #tpu.memory_space<vmem>>, vector<4x16xf32>
    %c0_1 = arith.constant 0 : index
    %c0_2 = arith.constant 0 : index
    %1 = vector.load %arg9[%c0_1, %c0_2] : memref<16x4xf32, #tpu.memory_space<vmem>>, vector<16x4xf32>
    %c0_3 = arith.constant 0 : index
    %c0_4 = arith.constant 0 : index
    %2 = vector.load %arg4[%c0_3, %c0_4] : memref<4x1xf32, #tpu.memory_space<vmem>>, vector<4x1xf32>
    %c0_5 = arith.constant 0 : index
    %c0_6 = arith.constant 0 : index
    %3 = vector.load %arg5[%c0_5, %c0_6] : memref<4x1xf32, #tpu.memory_space<vmem>>, vector<4x1xf32>
    %c0_7 = arith.constant 0 : index
    %c0_8 = arith.constant 0 : index
    %4 = vector.load %arg7[%c0_7, %c0_8] : memref<4x1xf32, #tpu.memory_space<vmem>>, vector<4x1xf32>
    %c0_9 = arith.constant 0 : index
    %c0_10 = arith.constant 0 : index
    %5 = vector.load %arg8[%c0_9, %c0_10] : memref<4x1xf32, #tpu.memory_space<vmem>>, vector<4x1xf32>
    %c0_11 = arith.constant 0 : index
    %c0_12 = arith.constant 0 : index
    %6 = vector.load %arg10[%c0_11, %c0_12] : memref<16x1xf32, #tpu.memory_space<vmem>>, vector<16x1xf32>
    %c0_13 = arith.constant 0 : index
    %c0_14 = arith.constant 0 : index
    %7 = vector.load %arg11[%c0_13, %c0_14] : memref<16x1xf32, #tpu.memory_space<vmem>>, vector<16x1xf32>
    %8 = tpu.iota {dimensions = array<i32: 1>} : vector<1x64xi32>
    %c8_i32 = arith.constant 8 : i32
    %c0_i32 = arith.constant 0 : i32
    %9 = arith.cmpi eq, %c8_i32, %c0_i32 : i32
    %c1_i32 = arith.constant 1 : i32
    %10 = arith.select %9, %c1_i32, %c8_i32 : i32
    %11 = vector.broadcast %10 : i32 to vector<1x64xi32>
    %12 = arith.remsi %8, %11 : vector<1x64xi32>
    %c0_i32_15 = arith.constant 0 : i32
    %13 = vector.broadcast %c0_i32_15 : i32 to vector<1x64xi32>
    %14 = arith.cmpi ne, %12, %13 : vector<1x64xi32>
    %c0_i32_16 = arith.constant 0 : i32
    %15 = vector.broadcast %c0_i32_16 : i32 to vector<1x64xi32>
    %16 = arith.cmpi slt, %12, %15 : vector<1x64xi32>
    %c0_i32_17 = arith.constant 0 : i32
    %17 = arith.cmpi slt, %10, %c0_i32_17 : i32
    %18 = vector.broadcast %17 : i1 to vector<1x64xi1>
    %19 = vector.broadcast %18 : vector<1x64xi1> to vector<1x64xi1>
    %20 = arith.xori %16, %19 : vector<1x64xi1>
    %21 = arith.andi %20, %14 : vector<1x64xi1>
    %22 = vector.broadcast %10 : i32 to vector<1x64xi32>
    %23 = arith.addi %12, %22 : vector<1x64xi32>
    %24 = arith.select %21, %23, %12 : vector<1x64xi1>, vector<1x64xi32>
    %c1_i32_18 = arith.constant 1 : i32
    %25 = vector.broadcast %c1_i32_18 : i32 to vector<1x64xi32>
    %26 = arith.cmpi sge, %24, %25 : vector<1x64xi32>
    %c6_i32 = arith.constant 6 : i32
    %27 = vector.broadcast %c6_i32 : i32 to vector<1x64xi32>
    %28 = arith.cmpi sle, %24, %27 : vector<1x64xi32>
    %cst = arith.constant 0.000000e+00 : f32
    %29 = vector.broadcast %cst : f32 to vector<4x9xf32>
    %c0_19 = arith.constant 0 : index
    %c0_20 = arith.constant 0 : index
    %30 = vector.load %arg13[%c0_19, %c0_20] : memref<4x82xf32, #tpu.memory_space<vmem>>, vector<4x9xf32>
    tpu.vector_store %arg13[%c0_19, %c0_20], %29 {strides = array<i32>} : memref<4x82xf32, #tpu.memory_space<vmem>>, vector<4x9xf32>,
    %c0_21 = arith.constant 0 : index
    %c73 = arith.constant 73 : index
    %31 = vector.load %arg13[%c0_21, %c73] : memref<4x82xf32, #tpu.memory_space<vmem>>, vector<4x9xf32>
    tpu.vector_store %arg13[%c0_21, %c73], %29 {strides = array<i32>} : memref<4x82xf32, #tpu.memory_space<vmem>>, vector<4x9xf32>,
    %c0_22 = arith.constant 0 : index
    %32 = arith.index_cast %arg1 : i32 to index
    %c0_23 = arith.constant 0 : index
    %c0_24 = arith.constant 0 : index
    %33 = vector.load %arg2[%c0_22, %32, %c0_23, %c0_24] : memref<1x4x16x64xf32, #tpu.memory_space<vmem>>, vector<1x1x16x64xf32>
    %34 = vector.shape_cast %33 : vector<1x1x16x64xf32> to vector<1x16x64xf32>
    %35 = vector.shape_cast %34 : vector<1x16x64xf32> to vector<16x64xf32>
    %cst_25 = arith.constant 0.000000e+00 : f32
    %36 = vector.broadcast %cst_25 : f32 to vector<4x64xf32>
    %c-1_i32 = arith.constant -1 : i32
    %37 = arith.addi %arg1, %c-1_i32 : i32
    %c0_i32_26 = arith.constant 0 : i32
    %c3_i32 = arith.constant 3 : i32
    %38 = arith.maxsi %c0_i32_26, %37 : i32
    %39 = arith.minsi %c3_i32, %38 : i32
    %c0_27 = arith.constant 0 : index
    %40 = arith.index_cast %39 : i32 to index
    %c0_28 = arith.constant 0 : index
    %c0_29 = arith.constant 0 : index
    %41 = vector.load %arg2[%c0_27, %40, %c0_28, %c0_29] : memref<1x4x16x64xf32, #tpu.memory_space<vmem>>, vector<1x1x16x64xf32>
    %42 = vector.shape_cast %41 : vector<1x1x16x64xf32> to vector<1x16x64xf32>
    %43 = vector.shape_cast %42 : vector<1x16x64xf32> to vector<16x64xf32>
    %cst_30 = arith.constant dense<0.000000e+00> : vector<4x64xf32>
    %44 = tpu.matmul %0, %43, %cst_30 {dimension_numbers = #tpu.dot_dimension_numbers<[1], [0], [0], [1], [0, 0, 1, 1], [], []>} : vector<4x16xf32>, vector<16x64xf32>, vector<4x64xf32> -> vector<4x64xf32>
    %45 = vector.broadcast %2 : vector<4x1xf32> to vector<4x64xf32>
    %46 = arith.mulf %44, %45 : vector<4x64xf32>
    %47 = vector.broadcast %3 : vector<4x1xf32> to vector<4x64xf32>
    %48 = arith.addf %46, %47 : vector<4x64xf32>
    %cst_31 = arith.constant 0.000000e+00 : f32
    %49 = vector.broadcast %cst_31 : f32 to vector<4x64xf32>
    %50 = arith.maximumf %48, %49 : vector<4x64xf32>
    %c0_i32_32 = arith.constant 0 : i32
    %51 = arith.cmpi sge, %37, %c0_i32_32 : i32
    %c4_i32 = arith.constant 4 : i32
    %52 = arith.cmpi slt, %37, %c4_i32 : i32
    %53 = arith.andi %51, %52 : i1
    %cst_33 = arith.constant 0.000000e+00 : f32
    %54 = vector.broadcast %cst_33 : f32 to vector<4x64xf32>
    %55 = arith.select %53, %50, %54 : vector<4x64xf32>
    %c0_34 = arith.constant 0 : index
    %c9 = arith.constant 9 : index
    %56 = vector.load %arg13[%c0_34, %c9] : memref<4x82xf32, #tpu.memory_space<vmem>>, vector<4x64xf32>
    tpu.vector_store %arg13[%c0_34, %c9], %55 {strides = array<i32>} : memref<4x82xf32, #tpu.memory_space<vmem>>, vector<4x64xf32>,
    %c0_35 = arith.constant 0 : index
    %c0_36 = arith.constant 0 : index
    %57 = vector.load %arg13[%c0_35, %c0_36] : memref<4x82xf32, #tpu.memory_space<vmem>>, vector<4x64xf32>
    %cst_37 = arith.constant 0.000000e+00 : f32
    %58 = vector.shape_cast %26 : vector<1x64xi1> to vector<1x64xi1>
    %59 = vector.broadcast %58 : vector<1x64xi1> to vector<4x64xi1>
    %60 = vector.broadcast %cst_37 : f32 to vector<4x64xf32>
    %61 = arith.select %59, %57, %60 : vector<4x64xi1>, vector<4x64xf32>
    %c0_38 = arith.constant 0 : index
    %c0_39 = arith.constant 0 : index
    %c0_40 = arith.constant 0 : index
    %c0_41 = arith.constant 0 : index
    %c0_42 = arith.constant 0 : index
    %62 = vector.load %arg6[%c0_38, %c0_39, %c0_40, %c0_41, %c0_42] : memref<3x3x3x4x4xf32, #tpu.memory_space<vmem>>, vector<1x1x1x4x4xf32>
    %63 = vector.shape_cast %62 : vector<1x1x1x4x4xf32> to vector<4x4xf32>
    %cst_43 = arith.constant dense<0.000000e+00> : vector<4x64xf32>
    %64 = tpu.matmul %63, %61, %cst_43 {dimension_numbers = #tpu.dot_dimension_numbers<[1], [0], [0], [1], [0, 0, 1, 1], [], []>} : vector<4x4xf32>, vector<4x64xf32>, vector<4x64xf32> -> vector<4x64xf32>
    %65 = arith.addf %36, %64 : vector<4x64xf32>
    %c0_44 = arith.constant 0 : index
    %c1 = arith.constant 1 : index
    %66 = vector.load %arg13[%c0_44, %c1] : memref<4x82xf32, #tpu.memory_space<vmem>>, vector<4x64xf32>
    %c0_45 = arith.constant 0 : index
    %c0_46 = arith.constant 0 : index
    %c1_47 = arith.constant 1 : index
    %c0_48 = arith.constant 0 : index
    %c0_49 = arith.constant 0 : index
    %67 = vector.load %arg6[%c0_45, %c0_46, %c1_47, %c0_48, %c0_49] : memref<3x3x3x4x4xf32, #tpu.memory_space<vmem>>, vector<1x1x1x4x4xf32>
    %68 = vector.shape_cast %67 : vector<1x1x1x4x4xf32> to vector<4x4xf32>
    %cst_50 = arith.constant dense<0.000000e+00> : vector<4x64xf32>
    %69 = tpu.matmul %68, %66, %cst_50 {dimension_numbers = #tpu.dot_dimension_numbers<[1], [0], [0], [1], [0, 0, 1, 1], [], []>} : vector<4x4xf32>, vector<4x64xf32>, vector<4x64xf32> -> vector<4x64xf32>
    %70 = arith.addf %65, %69 : vector<4x64xf32>
    %c0_51 = arith.constant 0 : index
    %c2 = arith.constant 2 : index
    %71 = vector.load %arg13[%c0_51, %c2] : memref<4x82xf32, #tpu.memory_space<vmem>>, vector<4x64xf32>
    %cst_52 = arith.constant 0.000000e+00 : f32
    %72 = vector.shape_cast %28 : vector<1x64xi1> to vector<1x64xi1>
    %73 = vector.broadcast %72 : vector<1x64xi1> to vector<4x64xi1>
    %74 = vector.broadcast %cst_52 : f32 to vector<4x64xf32>
    %75 = arith.select %73, %71, %74 : vector<4x64xi1>, vector<4x64xf32>
    %c0_53 = arith.constant 0 : index
    %c0_54 = arith.constant 0 : index
    %c2_55 = arith.constant 2 : index
    %c0_56 = arith.constant 0 : index
    %c0_57 = arith.constant 0 : index
    %76 = vector.load %arg6[%c0_53, %c0_54, %c2_55, %c0_56, %c0_57] : memref<3x3x3x4x4xf32, #tpu.memory_space<vmem>>, vector<1x1x1x4x4xf32>
    %77 = vector.shape_cast %76 : vector<1x1x1x4x4xf32> to vector<4x4xf32>
    %cst_58 = arith.constant dense<0.000000e+00> : vector<4x64xf32>
    %78 = tpu.matmul %77, %75, %cst_58 {dimension_numbers = #tpu.dot_dimension_numbers<[1], [0], [0], [1], [0, 0, 1, 1], [], []>} : vector<4x4xf32>, vector<4x64xf32>, vector<4x64xf32> -> vector<4x64xf32>
    %79 = arith.addf %70, %78 : vector<4x64xf32>
    %c0_59 = arith.constant 0 : index
    %c8 = arith.constant 8 : index
    %80 = vector.load %arg13[%c0_59, %c8] : memref<4x82xf32, #tpu.memory_space<vmem>>, vector<4x64xf32>
    %cst_60 = arith.constant 0.000000e+00 : f32
    %81 = vector.shape_cast %26 : vector<1x64xi1> to vector<1x64xi1>
    %82 = vector.broadcast %81 : vector<1x64xi1> to vector<4x64xi1>
    %83 = vector.broadcast %cst_60 : f32 to vector<4x64xf32>
    %84 = arith.select %82, %80, %83 : vector<4x64xi1>, vector<4x64xf32>
    %c0_61 = arith.constant 0 : index
    %c1_62 = arith.constant 1 : index
    %c0_63 = arith.constant 0 : index
    %c0_64 = arith.constant 0 : index
    %c0_65 = arith.constant 0 : index
    %85 = vector.load %arg6[%c0_61, %c1_62, %c0_63, %c0_64, %c0_65] : memref<3x3x3x4x4xf32, #tpu.memory_space<vmem>>, vector<1x1x1x4x4xf32>
    %86 = vector.shape_cast %85 : vector<1x1x1x4x4xf32> to vector<4x4xf32>
    %cst_66 = arith.constant dense<0.000000e+00> : vector<4x64xf32>
    %87 = tpu.matmul %86, %84, %cst_66 {dimension_numbers = #tpu.dot_dimension_numbers<[1], [0], [0], [1], [0, 0, 1, 1], [], []>} : vector<4x4xf32>, vector<4x64xf32>, vector<4x64xf32> -> vector<4x64xf32>
    %88 = arith.addf %79, %87 : vector<4x64xf32>
    %c0_67 = arith.constant 0 : index
    %c9_68 = arith.constant 9 : index
    %89 = vector.load %arg13[%c0_67, %c9_68] : memref<4x82xf32, #tpu.memory_space<vmem>>, vector<4x64xf32>
    %c0_69 = arith.constant 0 : index
    %c1_70 = arith.constant 1 : index
    %c1_71 = arith.constant 1 : index
    %c0_72 = arith.constant 0 : index
    %c0_73 = arith.constant 0 : index
    %90 = vector.load %arg6[%c0_69, %c1_70, %c1_71, %c0_72, %c0_73] : memref<3x3x3x4x4xf32, #tpu.memory_space<vmem>>, vector<1x1x1x4x4xf32>
    %91 = vector.shape_cast %90 : vector<1x1x1x4x4xf32> to vector<4x4xf32>
    %cst_74 = arith.constant dense<0.000000e+00> : vector<4x64xf32>
    %92 = tpu.matmul %91, %89, %cst_74 {dimension_numbers = #tpu.dot_dimension_numbers<[1], [0], [0], [1], [0, 0, 1, 1], [], []>} : vector<4x4xf32>, vector<4x64xf32>, vector<4x64xf32> -> vector<4x64xf32>
    %93 = arith.addf %88, %92 : vector<4x64xf32>
    %c0_75 = arith.constant 0 : index
    %c10 = arith.constant 10 : index
    %94 = vector.load %arg13[%c0_75, %c10] : memref<4x82xf32, #tpu.memory_space<vmem>>, vector<4x64xf32>
    %cst_76 = arith.constant 0.000000e+00 : f32
    %95 = vector.shape_cast %28 : vector<1x64xi1> to vector<1x64xi1>
    %96 = vector.broadcast %95 : vector<1x64xi1> to vector<4x64xi1>
    %97 = vector.broadcast %cst_76 : f32 to vector<4x64xf32>
    %98 = arith.select %96, %94, %97 : vector<4x64xi1>, vector<4x64xf32>
    %c0_77 = arith.constant 0 : index
    %c1_78 = arith.constant 1 : index
    %c2_79 = arith.constant 2 : index
    %c0_80 = arith.constant 0 : index
    %c0_81 = arith.constant 0 : index
    %99 = vector.load %arg6[%c0_77, %c1_78, %c2_79, %c0_80, %c0_81] : memref<3x3x3x4x4xf32, #tpu.memory_space<vmem>>, vector<1x1x1x4x4xf32>
    %100 = vector.shape_cast %99 : vector<1x1x1x4x4xf32> to vector<4x4xf32>
    %cst_82 = arith.constant dense<0.000000e+00> : vector<4x64xf32>
    %101 = tpu.matmul %100, %98, %cst_82 {dimension_numbers = #tpu.dot_dimension_numbers<[1], [0], [0], [1], [0, 0, 1, 1], [], []>} : vector<4x4xf32>, vector<4x64xf32>, vector<4x64xf32> -> vector<4x64xf32>
    %102 = arith.addf %93, %101 : vector<4x64xf32>
    %c0_83 = arith.constant 0 : index
    %c16 = arith.constant 16 : index
    %103 = vector.load %arg13[%c0_83, %c16] : memref<4x82xf32, #tpu.memory_space<vmem>>, vector<4x64xf32>
    %cst_84 = arith.constant 0.000000e+00 : f32
    %104 = vector.shape_cast %26 : vector<1x64xi1> to vector<1x64xi1>
    %105 = vector.broadcast %104 : vector<1x64xi1> to vector<4x64xi1>
    %106 = vector.broadcast %cst_84 : f32 to vector<4x64xf32>
    %107 = arith.select %105, %103, %106 : vector<4x64xi1>, vector<4x64xf32>
    %c0_85 = arith.constant 0 : index
    %c2_86 = arith.constant 2 : index
    %c0_87 = arith.constant 0 : index
    %c0_88 = arith.constant 0 : index
    %c0_89 = arith.constant 0 : index
    %108 = vector.load %arg6[%c0_85, %c2_86, %c0_87, %c0_88, %c0_89] : memref<3x3x3x4x4xf32, #tpu.memory_space<vmem>>, vector<1x1x1x4x4xf32>
    %109 = vector.shape_cast %108 : vector<1x1x1x4x4xf32> to vector<4x4xf32>
    %cst_90 = arith.constant dense<0.000000e+00> : vector<4x64xf32>
    %110 = tpu.matmul %109, %107, %cst_90 {dimension_numbers = #tpu.dot_dimension_numbers<[1], [0], [0], [1], [0, 0, 1, 1], [], []>} : vector<4x4xf32>, vector<4x64xf32>, vector<4x64xf32> -> vector<4x64xf32>
    %111 = arith.addf %102, %110 : vector<4x64xf32>
    %c0_91 = arith.constant 0 : index
    %c17 = arith.constant 17 : index
    %112 = vector.load %arg13[%c0_91, %c17] : memref<4x82xf32, #tpu.memory_space<vmem>>, vector<4x64xf32>
    %c0_92 = arith.constant 0 : index
    %c2_93 = arith.constant 2 : index
    %c1_94 = arith.constant 1 : index
    %c0_95 = arith.constant 0 : index
    %c0_96 = arith.constant 0 : index
    %113 = vector.load %arg6[%c0_92, %c2_93, %c1_94, %c0_95, %c0_96] : memref<3x3x3x4x4xf32, #tpu.memory_space<vmem>>, vector<1x1x1x4x4xf32>
    %114 = vector.shape_cast %113 : vector<1x1x1x4x4xf32> to vector<4x4xf32>
    %cst_97 = arith.constant dense<0.000000e+00> : vector<4x64xf32>
    %115 = tpu.matmul %114, %112, %cst_97 {dimension_numbers = #tpu.dot_dimension_numbers<[1], [0], [0], [1], [0, 0, 1, 1], [], []>} : vector<4x4xf32>, vector<4x64xf32>, vector<4x64xf32> -> vector<4x64xf32>
    %116 = arith.addf %111, %115 : vector<4x64xf32>
    %c0_98 = arith.constant 0 : index
    %c18 = arith.constant 18 : index
    %117 = vector.load %arg13[%c0_98, %c18] : memref<4x82xf32, #tpu.memory_space<vmem>>, vector<4x64xf32>
    %cst_99 = arith.constant 0.000000e+00 : f32
    %118 = vector.shape_cast %28 : vector<1x64xi1> to vector<1x64xi1>
    %119 = vector.broadcast %118 : vector<1x64xi1> to vector<4x64xi1>
    %120 = vector.broadcast %cst_99 : f32 to vector<4x64xf32>
    %121 = arith.select %119, %117, %120 : vector<4x64xi1>, vector<4x64xf32>
    %c0_100 = arith.constant 0 : index
    %c2_101 = arith.constant 2 : index
    %c2_102 = arith.constant 2 : index
    %c0_103 = arith.constant 0 : index
    %c0_104 = arith.constant 0 : index
    %122 = vector.load %arg6[%c0_100, %c2_101, %c2_102, %c0_103, %c0_104] : memref<3x3x3x4x4xf32, #tpu.memory_space<vmem>>, vector<1x1x1x4x4xf32>
    %123 = vector.shape_cast %122 : vector<1x1x1x4x4xf32> to vector<4x4xf32>
    %cst_105 = arith.constant dense<0.000000e+00> : vector<4x64xf32>
    %124 = tpu.matmul %123, %121, %cst_105 {dimension_numbers = #tpu.dot_dimension_numbers<[1], [0], [0], [1], [0, 0, 1, 1], [], []>} : vector<4x4xf32>, vector<4x64xf32>, vector<4x64xf32> -> vector<4x64xf32>
    %125 = arith.addf %116, %124 : vector<4x64xf32>
    %cst_106 = arith.constant dense<0.000000e+00> : vector<4x64xf32>
    %126 = tpu.matmul %0, %35, %cst_106 {dimension_numbers = #tpu.dot_dimension_numbers<[1], [0], [0], [1], [0, 0, 1, 1], [], []>} : vector<4x16xf32>, vector<16x64xf32>, vector<4x64xf32> -> vector<4x64xf32>
    %127 = vector.broadcast %2 : vector<4x1xf32> to vector<4x64xf32>
    %128 = arith.mulf %126, %127 : vector<4x64xf32>
    %129 = vector.broadcast %3 : vector<4x1xf32> to vector<4x64xf32>
    %130 = arith.addf %128, %129 : vector<4x64xf32>
    %cst_107 = arith.constant 0.000000e+00 : f32
    %131 = vector.broadcast %cst_107 : f32 to vector<4x64xf32>
    %132 = arith.maximumf %130, %131 : vector<4x64xf32>
    %c0_108 = arith.constant 0 : index
    %c9_109 = arith.constant 9 : index
    %133 = vector.load %arg13[%c0_108, %c9_109] : memref<4x82xf32, #tpu.memory_space<vmem>>, vector<4x64xf32>
    tpu.vector_store %arg13[%c0_108, %c9_109], %132 {strides = array<i32>} : memref<4x82xf32, #tpu.memory_space<vmem>>, vector<4x64xf32>,
    %c0_110 = arith.constant 0 : index
    %c0_111 = arith.constant 0 : index
    %134 = vector.load %arg13[%c0_110, %c0_111] : memref<4x82xf32, #tpu.memory_space<vmem>>, vector<4x64xf32>
    %cst_112 = arith.constant 0.000000e+00 : f32
    %135 = vector.shape_cast %26 : vector<1x64xi1> to vector<1x64xi1>
    %136 = vector.broadcast %135 : vector<1x64xi1> to vector<4x64xi1>
    %137 = vector.broadcast %cst_112 : f32 to vector<4x64xf32>
    %138 = arith.select %136, %134, %137 : vector<4x64xi1>, vector<4x64xf32>
    %c1_113 = arith.constant 1 : index
    %c0_114 = arith.constant 0 : index
    %c0_115 = arith.constant 0 : index
    %c0_116 = arith.constant 0 : index
    %c0_117 = arith.constant 0 : index
    %139 = vector.load %arg6[%c1_113, %c0_114, %c0_115, %c0_116, %c0_117] : memref<3x3x3x4x4xf32, #tpu.memory_space<vmem>>, vector<1x1x1x4x4xf32>
    %140 = vector.shape_cast %139 : vector<1x1x1x4x4xf32> to vector<4x4xf32>
    %cst_118 = arith.constant dense<0.000000e+00> : vector<4x64xf32>
    %141 = tpu.matmul %140, %138, %cst_118 {dimension_numbers = #tpu.dot_dimension_numbers<[1], [0], [0], [1], [0, 0, 1, 1], [], []>} : vector<4x4xf32>, vector<4x64xf32>, vector<4x64xf32> -> vector<4x64xf32>
    %142 = arith.addf %125, %141 : vector<4x64xf32>
    %c0_119 = arith.constant 0 : index
    %c1_120 = arith.constant 1 : index
    %143 = vector.load %arg13[%c0_119, %c1_120] : memref<4x82xf32, #tpu.memory_space<vmem>>, vector<4x64xf32>
    %c1_121 = arith.constant 1 : index
    %c0_122 = arith.constant 0 : index
    %c1_123 = arith.constant 1 : index
    %c0_124 = arith.constant 0 : index
    %c0_125 = arith.constant 0 : index
    %144 = vector.load %arg6[%c1_121, %c0_122, %c1_123, %c0_124, %c0_125] : memref<3x3x3x4x4xf32, #tpu.memory_space<vmem>>, vector<1x1x1x4x4xf32>
    %145 = vector.shape_cast %144 : vector<1x1x1x4x4xf32> to vector<4x4xf32>
    %cst_126 = arith.constant dense<0.000000e+00> : vector<4x64xf32>
    %146 = tpu.matmul %145, %143, %cst_126 {dimension_numbers = #tpu.dot_dimension_numbers<[1], [0], [0], [1], [0, 0, 1, 1], [], []>} : vector<4x4xf32>, vector<4x64xf32>, vector<4x64xf32> -> vector<4x64xf32>
    %147 = arith.addf %142, %146 : vector<4x64xf32>
    %c0_127 = arith.constant 0 : index
    %c2_128 = arith.constant 2 : index
    %148 = vector.load %arg13[%c0_127, %c2_128] : memref<4x82xf32, #tpu.memory_space<vmem>>, vector<4x64xf32>
    %cst_129 = arith.constant 0.000000e+00 : f32
    %149 = vector.shape_cast %28 : vector<1x64xi1> to vector<1x64xi1>
    %150 = vector.broadcast %149 : vector<1x64xi1> to vector<4x64xi1>
    %151 = vector.broadcast %cst_129 : f32 to vector<4x64xf32>
    %152 = arith.select %150, %148, %151 : vector<4x64xi1>, vector<4x64xf32>
    %c1_130 = arith.constant 1 : index
    %c0_131 = arith.constant 0 : index
    %c2_132 = arith.constant 2 : index
    %c0_133 = arith.constant 0 : index
    %c0_134 = arith.constant 0 : index
    %153 = vector.load %arg6[%c1_130, %c0_131, %c2_132, %c0_133, %c0_134] : memref<3x3x3x4x4xf32, #tpu.memory_space<vmem>>, vector<1x1x1x4x4xf32>
    %154 = vector.shape_cast %153 : vector<1x1x1x4x4xf32> to vector<4x4xf32>
    %cst_135 = arith.constant dense<0.000000e+00> : vector<4x64xf32>
    %155 = tpu.matmul %154, %152, %cst_135 {dimension_numbers = #tpu.dot_dimension_numbers<[1], [0], [0], [1], [0, 0, 1, 1], [], []>} : vector<4x4xf32>, vector<4x64xf32>, vector<4x64xf32> -> vector<4x64xf32>
    %156 = arith.addf %147, %155 : vector<4x64xf32>
    %c0_136 = arith.constant 0 : index
    %c8_137 = arith.constant 8 : index
    %157 = vector.load %arg13[%c0_136, %c8_137] : memref<4x82xf32, #tpu.memory_space<vmem>>, vector<4x64xf32>
    %cst_138 = arith.constant 0.000000e+00 : f32
    %158 = vector.shape_cast %26 : vector<1x64xi1> to vector<1x64xi1>
    %159 = vector.broadcast %158 : vector<1x64xi1> to vector<4x64xi1>
    %160 = vector.broadcast %cst_138 : f32 to vector<4x64xf32>
    %161 = arith.select %159, %157, %160 : vector<4x64xi1>, vector<4x64xf32>
    %c1_139 = arith.constant 1 : index
    %c1_140 = arith.constant 1 : index
    %c0_141 = arith.constant 0 : index
    %c0_142 = arith.constant 0 : index
    %c0_143 = arith.constant 0 : index
    %162 = vector.load %arg6[%c1_139, %c1_140, %c0_141, %c0_142, %c0_143] : memref<3x3x3x4x4xf32, #tpu.memory_space<vmem>>, vector<1x1x1x4x4xf32>
    %163 = vector.shape_cast %162 : vector<1x1x1x4x4xf32> to vector<4x4xf32>
    %cst_144 = arith.constant dense<0.000000e+00> : vector<4x64xf32>
    %164 = tpu.matmul %163, %161, %cst_144 {dimension_numbers = #tpu.dot_dimension_numbers<[1], [0], [0], [1], [0, 0, 1, 1], [], []>} : vector<4x4xf32>, vector<4x64xf32>, vector<4x64xf32> -> vector<4x64xf32>
    %165 = arith.addf %156, %164 : vector<4x64xf32>
    %c0_145 = arith.constant 0 : index
    %c9_146 = arith.constant 9 : index
    %166 = vector.load %arg13[%c0_145, %c9_146] : memref<4x82xf32, #tpu.memory_space<vmem>>, vector<4x64xf32>
    %c1_147 = arith.constant 1 : index
    %c1_148 = arith.constant 1 : index
    %c1_149 = arith.constant 1 : index
    %c0_150 = arith.constant 0 : index
    %c0_151 = arith.constant 0 : index
    %167 = vector.load %arg6[%c1_147, %c1_148, %c1_149, %c0_150, %c0_151] : memref<3x3x3x4x4xf32, #tpu.memory_space<vmem>>, vector<1x1x1x4x4xf32>
    %168 = vector.shape_cast %167 : vector<1x1x1x4x4xf32> to vector<4x4xf32>
    %cst_152 = arith.constant dense<0.000000e+00> : vector<4x64xf32>
    %169 = tpu.matmul %168, %166, %cst_152 {dimension_numbers = #tpu.dot_dimension_numbers<[1], [0], [0], [1], [0, 0, 1, 1], [], []>} : vector<4x4xf32>, vector<4x64xf32>, vector<4x64xf32> -> vector<4x64xf32>
    %170 = arith.addf %165, %169 : vector<4x64xf32>
    %c0_153 = arith.constant 0 : index
    %c10_154 = arith.constant 10 : index
    %171 = vector.load %arg13[%c0_153, %c10_154] : memref<4x82xf32, #tpu.memory_space<vmem>>, vector<4x64xf32>
    %cst_155 = arith.constant 0.000000e+00 : f32
    %172 = vector.shape_cast %28 : vector<1x64xi1> to vector<1x64xi1>
    %173 = vector.broadcast %172 : vector<1x64xi1> to vector<4x64xi1>
    %174 = vector.broadcast %cst_155 : f32 to vector<4x64xf32>
    %175 = arith.select %173, %171, %174 : vector<4x64xi1>, vector<4x64xf32>
    %c1_156 = arith.constant 1 : index
    %c1_157 = arith.constant 1 : index
    %c2_158 = arith.constant 2 : index
    %c0_159 = arith.constant 0 : index
    %c0_160 = arith.constant 0 : index
    %176 = vector.load %arg6[%c1_156, %c1_157, %c2_158, %c0_159, %c0_160] : memref<3x3x3x4x4xf32, #tpu.memory_space<vmem>>, vector<1x1x1x4x4xf32>
    %177 = vector.shape_cast %176 : vector<1x1x1x4x4xf32> to vector<4x4xf32>
    %cst_161 = arith.constant dense<0.000000e+00> : vector<4x64xf32>
    %178 = tpu.matmul %177, %175, %cst_161 {dimension_numbers = #tpu.dot_dimension_numbers<[1], [0], [0], [1], [0, 0, 1, 1], [], []>} : vector<4x4xf32>, vector<4x64xf32>, vector<4x64xf32> -> vector<4x64xf32>
    %179 = arith.addf %170, %178 : vector<4x64xf32>
    %c0_162 = arith.constant 0 : index
    %c16_163 = arith.constant 16 : index
    %180 = vector.load %arg13[%c0_162, %c16_163] : memref<4x82xf32, #tpu.memory_space<vmem>>, vector<4x64xf32>
    %cst_164 = arith.constant 0.000000e+00 : f32
    %181 = vector.shape_cast %26 : vector<1x64xi1> to vector<1x64xi1>
    %182 = vector.broadcast %181 : vector<1x64xi1> to vector<4x64xi1>
    %183 = vector.broadcast %cst_164 : f32 to vector<4x64xf32>
    %184 = arith.select %182, %180, %183 : vector<4x64xi1>, vector<4x64xf32>
    %c1_165 = arith.constant 1 : index
    %c2_166 = arith.constant 2 : index
    %c0_167 = arith.constant 0 : index
    %c0_168 = arith.constant 0 : index
    %c0_169 = arith.constant 0 : index
    %185 = vector.load %arg6[%c1_165, %c2_166, %c0_167, %c0_168, %c0_169] : memref<3x3x3x4x4xf32, #tpu.memory_space<vmem>>, vector<1x1x1x4x4xf32>
    %186 = vector.shape_cast %185 : vector<1x1x1x4x4xf32> to vector<4x4xf32>
    %cst_170 = arith.constant dense<0.000000e+00> : vector<4x64xf32>
    %187 = tpu.matmul %186, %184, %cst_170 {dimension_numbers = #tpu.dot_dimension_numbers<[1], [0], [0], [1], [0, 0, 1, 1], [], []>} : vector<4x4xf32>, vector<4x64xf32>, vector<4x64xf32> -> vector<4x64xf32>
    %188 = arith.addf %179, %187 : vector<4x64xf32>
    %c0_171 = arith.constant 0 : index
    %c17_172 = arith.constant 17 : index
    %189 = vector.load %arg13[%c0_171, %c17_172] : memref<4x82xf32, #tpu.memory_space<vmem>>, vector<4x64xf32>
    %c1_173 = arith.constant 1 : index
    %c2_174 = arith.constant 2 : index
    %c1_175 = arith.constant 1 : index
    %c0_176 = arith.constant 0 : index
    %c0_177 = arith.constant 0 : index
    %190 = vector.load %arg6[%c1_173, %c2_174, %c1_175, %c0_176, %c0_177] : memref<3x3x3x4x4xf32, #tpu.memory_space<vmem>>, vector<1x1x1x4x4xf32>
    %191 = vector.shape_cast %190 : vector<1x1x1x4x4xf32> to vector<4x4xf32>
    %cst_178 = arith.constant dense<0.000000e+00> : vector<4x64xf32>
    %192 = tpu.matmul %191, %189, %cst_178 {dimension_numbers = #tpu.dot_dimension_numbers<[1], [0], [0], [1], [0, 0, 1, 1], [], []>} : vector<4x4xf32>, vector<4x64xf32>, vector<4x64xf32> -> vector<4x64xf32>
    %193 = arith.addf %188, %192 : vector<4x64xf32>
    %c0_179 = arith.constant 0 : index
    %c18_180 = arith.constant 18 : index
    %194 = vector.load %arg13[%c0_179, %c18_180] : memref<4x82xf32, #tpu.memory_space<vmem>>, vector<4x64xf32>
    %cst_181 = arith.constant 0.000000e+00 : f32
    %195 = vector.shape_cast %28 : vector<1x64xi1> to vector<1x64xi1>
    %196 = vector.broadcast %195 : vector<1x64xi1> to vector<4x64xi1>
    %197 = vector.broadcast %cst_181 : f32 to vector<4x64xf32>
    %198 = arith.select %196, %194, %197 : vector<4x64xi1>, vector<4x64xf32>
    %c1_182 = arith.constant 1 : index
    %c2_183 = arith.constant 2 : index
    %c2_184 = arith.constant 2 : index
    %c0_185 = arith.constant 0 : index
    %c0_186 = arith.constant 0 : index
    %199 = vector.load %arg6[%c1_182, %c2_183, %c2_184, %c0_185, %c0_186] : memref<3x3x3x4x4xf32, #tpu.memory_space<vmem>>, vector<1x1x1x4x4xf32>
    %200 = vector.shape_cast %199 : vector<1x1x1x4x4xf32> to vector<4x4xf32>
    %cst_187 = arith.constant dense<0.000000e+00> : vector<4x64xf32>
    %201 = tpu.matmul %200, %198, %cst_187 {dimension_numbers = #tpu.dot_dimension_numbers<[1], [0], [0], [1], [0, 0, 1, 1], [], []>} : vector<4x4xf32>, vector<4x64xf32>, vector<4x64xf32> -> vector<4x64xf32>
    %202 = arith.addf %193, %201 : vector<4x64xf32>
    %c1_i32_188 = arith.constant 1 : i32
    %203 = arith.addi %arg1, %c1_i32_188 : i32
    %c0_i32_189 = arith.constant 0 : i32
    %c3_i32_190 = arith.constant 3 : i32
    %204 = arith.maxsi %c0_i32_189, %203 : i32
    %205 = arith.minsi %c3_i32_190, %204 : i32
    %c0_191 = arith.constant 0 : index
    %206 = arith.index_cast %205 : i32 to index
    %c0_192 = arith.constant 0 : index
    %c0_193 = arith.constant 0 : index
    %207 = vector.load %arg2[%c0_191, %206, %c0_192, %c0_193] : memref<1x4x16x64xf32, #tpu.memory_space<vmem>>, vector<1x1x16x64xf32>
    %208 = vector.shape_cast %207 : vector<1x1x16x64xf32> to vector<1x16x64xf32>
    %209 = vector.shape_cast %208 : vector<1x16x64xf32> to vector<16x64xf32>
    %cst_194 = arith.constant dense<0.000000e+00> : vector<4x64xf32>
    %210 = tpu.matmul %0, %209, %cst_194 {dimension_numbers = #tpu.dot_dimension_numbers<[1], [0], [0], [1], [0, 0, 1, 1], [], []>} : vector<4x16xf32>, vector<16x64xf32>, vector<4x64xf32> -> vector<4x64xf32>
    %211 = vector.broadcast %2 : vector<4x1xf32> to vector<4x64xf32>
    %212 = arith.mulf %210, %211 : vector<4x64xf32>
    %213 = vector.broadcast %3 : vector<4x1xf32> to vector<4x64xf32>
    %214 = arith.addf %212, %213 : vector<4x64xf32>
    %cst_195 = arith.constant 0.000000e+00 : f32
    %215 = vector.broadcast %cst_195 : f32 to vector<4x64xf32>
    %216 = arith.maximumf %214, %215 : vector<4x64xf32>
    %c0_i32_196 = arith.constant 0 : i32
    %217 = arith.cmpi sge, %203, %c0_i32_196 : i32
    %c4_i32_197 = arith.constant 4 : i32
    %218 = arith.cmpi slt, %203, %c4_i32_197 : i32
    %219 = arith.andi %217, %218 : i1
    %cst_198 = arith.constant 0.000000e+00 : f32
    %220 = vector.broadcast %cst_198 : f32 to vector<4x64xf32>
    %221 = arith.select %219, %216, %220 : vector<4x64xf32>
    %c0_199 = arith.constant 0 : index
    %c9_200 = arith.constant 9 : index
    %222 = vector.load %arg13[%c0_199, %c9_200] : memref<4x82xf32, #tpu.memory_space<vmem>>, vector<4x64xf32>
    tpu.vector_store %arg13[%c0_199, %c9_200], %221 {strides = array<i32>} : memref<4x82xf32, #tpu.memory_space<vmem>>, vector<4x64xf32>,
    %c0_201 = arith.constant 0 : index
    %c0_202 = arith.constant 0 : index
    %223 = vector.load %arg13[%c0_201, %c0_202] : memref<4x82xf32, #tpu.memory_space<vmem>>, vector<4x64xf32>
    %cst_203 = arith.constant 0.000000e+00 : f32
    %224 = vector.shape_cast %26 : vector<1x64xi1> to vector<1x64xi1>
    %225 = vector.broadcast %224 : vector<1x64xi1> to vector<4x64xi1>
    %226 = vector.broadcast %cst_203 : f32 to vector<4x64xf32>
    %227 = arith.select %225, %223, %226 : vector<4x64xi1>, vector<4x64xf32>
    %c2_204 = arith.constant 2 : index
    %c0_205 = arith.constant 0 : index
    %c0_206 = arith.constant 0 : index
    %c0_207 = arith.constant 0 : index
    %c0_208 = arith.constant 0 : index
    %228 = vector.load %arg6[%c2_204, %c0_205, %c0_206, %c0_207, %c0_208] : memref<3x3x3x4x4xf32, #tpu.memory_space<vmem>>, vector<1x1x1x4x4xf32>
    %229 = vector.shape_cast %228 : vector<1x1x1x4x4xf32> to vector<4x4xf32>
    %cst_209 = arith.constant dense<0.000000e+00> : vector<4x64xf32>
    %230 = tpu.matmul %229, %227, %cst_209 {dimension_numbers = #tpu.dot_dimension_numbers<[1], [0], [0], [1], [0, 0, 1, 1], [], []>} : vector<4x4xf32>, vector<4x64xf32>, vector<4x64xf32> -> vector<4x64xf32>
    %231 = arith.addf %202, %230 : vector<4x64xf32>
    %c0_210 = arith.constant 0 : index
    %c1_211 = arith.constant 1 : index
    %232 = vector.load %arg13[%c0_210, %c1_211] : memref<4x82xf32, #tpu.memory_space<vmem>>, vector<4x64xf32>
    %c2_212 = arith.constant 2 : index
    %c0_213 = arith.constant 0 : index
    %c1_214 = arith.constant 1 : index
    %c0_215 = arith.constant 0 : index
    %c0_216 = arith.constant 0 : index
    %233 = vector.load %arg6[%c2_212, %c0_213, %c1_214, %c0_215, %c0_216] : memref<3x3x3x4x4xf32, #tpu.memory_space<vmem>>, vector<1x1x1x4x4xf32>
    %234 = vector.shape_cast %233 : vector<1x1x1x4x4xf32> to vector<4x4xf32>
    %cst_217 = arith.constant dense<0.000000e+00> : vector<4x64xf32>
    %235 = tpu.matmul %234, %232, %cst_217 {dimension_numbers = #tpu.dot_dimension_numbers<[1], [0], [0], [1], [0, 0, 1, 1], [], []>} : vector<4x4xf32>, vector<4x64xf32>, vector<4x64xf32> -> vector<4x64xf32>
    %236 = arith.addf %231, %235 : vector<4x64xf32>
    %c0_218 = arith.constant 0 : index
    %c2_219 = arith.constant 2 : index
    %237 = vector.load %arg13[%c0_218, %c2_219] : memref<4x82xf32, #tpu.memory_space<vmem>>, vector<4x64xf32>
    %cst_220 = arith.constant 0.000000e+00 : f32
    %238 = vector.shape_cast %28 : vector<1x64xi1> to vector<1x64xi1>
    %239 = vector.broadcast %238 : vector<1x64xi1> to vector<4x64xi1>
    %240 = vector.broadcast %cst_220 : f32 to vector<4x64xf32>
    %241 = arith.select %239, %237, %240 : vector<4x64xi1>, vector<4x64xf32>
    %c2_221 = arith.constant 2 : index
    %c0_222 = arith.constant 0 : index
    %c2_223 = arith.constant 2 : index
    %c0_224 = arith.constant 0 : index
    %c0_225 = arith.constant 0 : index
    %242 = vector.load %arg6[%c2_221, %c0_222, %c2_223, %c0_224, %c0_225] : memref<3x3x3x4x4xf32, #tpu.memory_space<vmem>>, vector<1x1x1x4x4xf32>
    %243 = vector.shape_cast %242 : vector<1x1x1x4x4xf32> to vector<4x4xf32>
    %cst_226 = arith.constant dense<0.000000e+00> : vector<4x64xf32>
    %244 = tpu.matmul %243, %241, %cst_226 {dimension_numbers = #tpu.dot_dimension_numbers<[1], [0], [0], [1], [0, 0, 1, 1], [], []>} : vector<4x4xf32>, vector<4x64xf32>, vector<4x64xf32> -> vector<4x64xf32>
    %245 = arith.addf %236, %244 : vector<4x64xf32>
    %c0_227 = arith.constant 0 : index
    %c8_228 = arith.constant 8 : index
    %246 = vector.load %arg13[%c0_227, %c8_228] : memref<4x82xf32, #tpu.memory_space<vmem>>, vector<4x64xf32>
    %cst_229 = arith.constant 0.000000e+00 : f32
    %247 = vector.shape_cast %26 : vector<1x64xi1> to vector<1x64xi1>
    %248 = vector.broadcast %247 : vector<1x64xi1> to vector<4x64xi1>
    %249 = vector.broadcast %cst_229 : f32 to vector<4x64xf32>
    %250 = arith.select %248, %246, %249 : vector<4x64xi1>, vector<4x64xf32>
    %c2_230 = arith.constant 2 : index
    %c1_231 = arith.constant 1 : index
    %c0_232 = arith.constant 0 : index
    %c0_233 = arith.constant 0 : index
    %c0_234 = arith.constant 0 : index
    %251 = vector.load %arg6[%c2_230, %c1_231, %c0_232, %c0_233, %c0_234] : memref<3x3x3x4x4xf32, #tpu.memory_space<vmem>>, vector<1x1x1x4x4xf32>
    %252 = vector.shape_cast %251 : vector<1x1x1x4x4xf32> to vector<4x4xf32>
    %cst_235 = arith.constant dense<0.000000e+00> : vector<4x64xf32>
    %253 = tpu.matmul %252, %250, %cst_235 {dimension_numbers = #tpu.dot_dimension_numbers<[1], [0], [0], [1], [0, 0, 1, 1], [], []>} : vector<4x4xf32>, vector<4x64xf32>, vector<4x64xf32> -> vector<4x64xf32>
    %254 = arith.addf %245, %253 : vector<4x64xf32>
    %c0_236 = arith.constant 0 : index
    %c9_237 = arith.constant 9 : index
    %255 = vector.load %arg13[%c0_236, %c9_237] : memref<4x82xf32, #tpu.memory_space<vmem>>, vector<4x64xf32>
    %c2_238 = arith.constant 2 : index
    %c1_239 = arith.constant 1 : index
    %c1_240 = arith.constant 1 : index
    %c0_241 = arith.constant 0 : index
    %c0_242 = arith.constant 0 : index
    %256 = vector.load %arg6[%c2_238, %c1_239, %c1_240, %c0_241, %c0_242] : memref<3x3x3x4x4xf32, #tpu.memory_space<vmem>>, vector<1x1x1x4x4xf32>
    %257 = vector.shape_cast %256 : vector<1x1x1x4x4xf32> to vector<4x4xf32>
    %cst_243 = arith.constant dense<0.000000e+00> : vector<4x64xf32>
    %258 = tpu.matmul %257, %255, %cst_243 {dimension_numbers = #tpu.dot_dimension_numbers<[1], [0], [0], [1], [0, 0, 1, 1], [], []>} : vector<4x4xf32>, vector<4x64xf32>, vector<4x64xf32> -> vector<4x64xf32>
    %259 = arith.addf %254, %258 : vector<4x64xf32>
    %c0_244 = arith.constant 0 : index
    %c10_245 = arith.constant 10 : index
    %260 = vector.load %arg13[%c0_244, %c10_245] : memref<4x82xf32, #tpu.memory_space<vmem>>, vector<4x64xf32>
    %cst_246 = arith.constant 0.000000e+00 : f32
    %261 = vector.shape_cast %28 : vector<1x64xi1> to vector<1x64xi1>
    %262 = vector.broadcast %261 : vector<1x64xi1> to vector<4x64xi1>
    %263 = vector.broadcast %cst_246 : f32 to vector<4x64xf32>
    %264 = arith.select %262, %260, %263 : vector<4x64xi1>, vector<4x64xf32>
    %c2_247 = arith.constant 2 : index
    %c1_248 = arith.constant 1 : index
    %c2_249 = arith.constant 2 : index
    %c0_250 = arith.constant 0 : index
    %c0_251 = arith.constant 0 : index
    %265 = vector.load %arg6[%c2_247, %c1_248, %c2_249, %c0_250, %c0_251] : memref<3x3x3x4x4xf32, #tpu.memory_space<vmem>>, vector<1x1x1x4x4xf32>
    %266 = vector.shape_cast %265 : vector<1x1x1x4x4xf32> to vector<4x4xf32>
    %cst_252 = arith.constant dense<0.000000e+00> : vector<4x64xf32>
    %267 = tpu.matmul %266, %264, %cst_252 {dimension_numbers = #tpu.dot_dimension_numbers<[1], [0], [0], [1], [0, 0, 1, 1], [], []>} : vector<4x4xf32>, vector<4x64xf32>, vector<4x64xf32> -> vector<4x64xf32>
    %268 = arith.addf %259, %267 : vector<4x64xf32>
    %c0_253 = arith.constant 0 : index
    %c16_254 = arith.constant 16 : index
    %269 = vector.load %arg13[%c0_253, %c16_254] : memref<4x82xf32, #tpu.memory_space<vmem>>, vector<4x64xf32>
    %cst_255 = arith.constant 0.000000e+00 : f32
    %270 = vector.shape_cast %26 : vector<1x64xi1> to vector<1x64xi1>
    %271 = vector.broadcast %270 : vector<1x64xi1> to vector<4x64xi1>
    %272 = vector.broadcast %cst_255 : f32 to vector<4x64xf32>
    %273 = arith.select %271, %269, %272 : vector<4x64xi1>, vector<4x64xf32>
    %c2_256 = arith.constant 2 : index
    %c2_257 = arith.constant 2 : index
    %c0_258 = arith.constant 0 : index
    %c0_259 = arith.constant 0 : index
    %c0_260 = arith.constant 0 : index
    %274 = vector.load %arg6[%c2_256, %c2_257, %c0_258, %c0_259, %c0_260] : memref<3x3x3x4x4xf32, #tpu.memory_space<vmem>>, vector<1x1x1x4x4xf32>
    %275 = vector.shape_cast %274 : vector<1x1x1x4x4xf32> to vector<4x4xf32>
    %cst_261 = arith.constant dense<0.000000e+00> : vector<4x64xf32>
    %276 = tpu.matmul %275, %273, %cst_261 {dimension_numbers = #tpu.dot_dimension_numbers<[1], [0], [0], [1], [0, 0, 1, 1], [], []>} : vector<4x4xf32>, vector<4x64xf32>, vector<4x64xf32> -> vector<4x64xf32>
    %277 = arith.addf %268, %276 : vector<4x64xf32>
    %c0_262 = arith.constant 0 : index
    %c17_263 = arith.constant 17 : index
    %278 = vector.load %arg13[%c0_262, %c17_263] : memref<4x82xf32, #tpu.memory_space<vmem>>, vector<4x64xf32>
    %c2_264 = arith.constant 2 : index
    %c2_265 = arith.constant 2 : index
    %c1_266 = arith.constant 1 : index
    %c0_267 = arith.constant 0 : index
    %c0_268 = arith.constant 0 : index
    %279 = vector.load %arg6[%c2_264, %c2_265, %c1_266, %c0_267, %c0_268] : memref<3x3x3x4x4xf32, #tpu.memory_space<vmem>>, vector<1x1x1x4x4xf32>
    %280 = vector.shape_cast %279 : vector<1x1x1x4x4xf32> to vector<4x4xf32>
    %cst_269 = arith.constant dense<0.000000e+00> : vector<4x64xf32>
    %281 = tpu.matmul %280, %278, %cst_269 {dimension_numbers = #tpu.dot_dimension_numbers<[1], [0], [0], [1], [0, 0, 1, 1], [], []>} : vector<4x4xf32>, vector<4x64xf32>, vector<4x64xf32> -> vector<4x64xf32>
    %282 = arith.addf %277, %281 : vector<4x64xf32>
    %c0_270 = arith.constant 0 : index
    %c18_271 = arith.constant 18 : index
    %283 = vector.load %arg13[%c0_270, %c18_271] : memref<4x82xf32, #tpu.memory_space<vmem>>, vector<4x64xf32>
    %cst_272 = arith.constant 0.000000e+00 : f32
    %284 = vector.shape_cast %28 : vector<1x64xi1> to vector<1x64xi1>
    %285 = vector.broadcast %284 : vector<1x64xi1> to vector<4x64xi1>
    %286 = vector.broadcast %cst_272 : f32 to vector<4x64xf32>
    %287 = arith.select %285, %283, %286 : vector<4x64xi1>, vector<4x64xf32>
    %c2_273 = arith.constant 2 : index
    %c2_274 = arith.constant 2 : index
    %c2_275 = arith.constant 2 : index
    %c0_276 = arith.constant 0 : index
    %c0_277 = arith.constant 0 : index
    %288 = vector.load %arg6[%c2_273, %c2_274, %c2_275, %c0_276, %c0_277] : memref<3x3x3x4x4xf32, #tpu.memory_space<vmem>>, vector<1x1x1x4x4xf32>
    %289 = vector.shape_cast %288 : vector<1x1x1x4x4xf32> to vector<4x4xf32>
    %cst_278 = arith.constant dense<0.000000e+00> : vector<4x64xf32>
    %290 = tpu.matmul %289, %287, %cst_278 {dimension_numbers = #tpu.dot_dimension_numbers<[1], [0], [0], [1], [0, 0, 1, 1], [], []>} : vector<4x4xf32>, vector<4x64xf32>, vector<4x64xf32> -> vector<4x64xf32>
    %291 = arith.addf %282, %290 : vector<4x64xf32>
    %292 = vector.broadcast %4 : vector<4x1xf32> to vector<4x64xf32>
    %293 = arith.mulf %291, %292 : vector<4x64xf32>
    %294 = vector.broadcast %5 : vector<4x1xf32> to vector<4x64xf32>
    %295 = arith.addf %293, %294 : vector<4x64xf32>
    %cst_279 = arith.constant 0.000000e+00 : f32
    %296 = vector.broadcast %cst_279 : f32 to vector<4x64xf32>
    %297 = arith.maximumf %295, %296 : vector<4x64xf32>
    %cst_280 = arith.constant dense<0.000000e+00> : vector<16x64xf32>
    %298 = tpu.matmul %1, %297, %cst_280 {dimension_numbers = #tpu.dot_dimension_numbers<[1], [0], [0], [1], [0, 0, 1, 1], [], []>} : vector<16x4xf32>, vector<4x64xf32>, vector<16x64xf32> -> vector<16x64xf32>
    %299 = vector.broadcast %6 : vector<16x1xf32> to vector<16x64xf32>
    %300 = arith.mulf %298, %299 : vector<16x64xf32>
    %301 = vector.broadcast %7 : vector<16x1xf32> to vector<16x64xf32>
    %302 = arith.addf %300, %301 : vector<16x64xf32>
    %303 = arith.addf %302, %35 : vector<16x64xf32>
    %cst_281 = arith.constant 0.000000e+00 : f32
    %304 = vector.broadcast %cst_281 : f32 to vector<16x64xf32>
    %305 = arith.maximumf %303, %304 : vector<16x64xf32>
    %c0_282 = arith.constant 0 : index
    %c0_283 = arith.constant 0 : index
    %c0_284 = arith.constant 0 : index
    %c0_285 = arith.constant 0 : index
    %306 = vector.load %arg12[%c0_282, %c0_283, %c0_284, %c0_285] : memref<1x1x16x64xf32, #tpu.memory_space<vmem>>, vector<1x1x16x64xf32>
    %307 = vector.shape_cast %306 : vector<1x1x16x64xf32> to vector<16x64xf32>
    %308 = vector.shape_cast %305 : vector<16x64xf32> to vector<1x1x16x64xf32>
    tpu.vector_store %arg12[%c0_282, %c0_283, %c0_284, %c0_285], %308 {strides = array<i32>} : memref<1x1x16x64xf32, #tpu.memory_space<vmem>>, vector<1x1x16x64xf32>,
    return
  }
  func.func @transform_0(%arg0: i32, %arg1: i32) -> (i32, i32, i32, i32) {
    %c0_i32 = arith.constant 0 : i32
    %c0_i32_0 = arith.constant 0 : i32
    %c0_i32_1 = arith.constant 0 : i32
    %c0_i32_2 = arith.constant 0 : i32
    return %arg0, %c0_i32, %c0_i32_0, %c0_i32_1 : i32, i32, i32, i32
  }
  func.func @transform_1(%arg0: i32, %arg1: i32) -> (i32, i32) {
    %c0_i32 = arith.constant 0 : i32
    %c0_i32_0 = arith.constant 0 : i32
    %c0_i32_1 = arith.constant 0 : i32
    return %c0_i32, %c0_i32_0 : i32, i32
  }
  func.func @transform_2(%arg0: i32, %arg1: i32) -> (i32, i32) {
    %c0_i32 = arith.constant 0 : i32
    %c0_i32_0 = arith.constant 0 : i32
    %c0_i32_1 = arith.constant 0 : i32
    return %c0_i32, %c0_i32_0 : i32, i32
  }
  func.func @transform_3(%arg0: i32, %arg1: i32) -> (i32, i32) {
    %c0_i32 = arith.constant 0 : i32
    %c0_i32_0 = arith.constant 0 : i32
    %c0_i32_1 = arith.constant 0 : i32
    return %c0_i32, %c0_i32_0 : i32, i32
  }
  func.func @transform_4(%arg0: i32, %arg1: i32) -> (i32, i32, i32, i32, i32) {
    %c0_i32 = arith.constant 0 : i32
    %c0_i32_0 = arith.constant 0 : i32
    %c0_i32_1 = arith.constant 0 : i32
    %c0_i32_2 = arith.constant 0 : i32
    %c0_i32_3 = arith.constant 0 : i32
    %c0_i32_4 = arith.constant 0 : i32
    return %c0_i32, %c0_i32_0, %c0_i32_1, %c0_i32_2, %c0_i32_3 : i32, i32, i32, i32, i32
  }
  func.func @transform_5(%arg0: i32, %arg1: i32) -> (i32, i32) {
    %c0_i32 = arith.constant 0 : i32
    %c0_i32_0 = arith.constant 0 : i32
    %c0_i32_1 = arith.constant 0 : i32
    return %c0_i32, %c0_i32_0 : i32, i32
  }
  func.func @transform_6(%arg0: i32, %arg1: i32) -> (i32, i32) {
    %c0_i32 = arith.constant 0 : i32
    %c0_i32_0 = arith.constant 0 : i32
    %c0_i32_1 = arith.constant 0 : i32
    return %c0_i32, %c0_i32_0 : i32, i32
  }
  func.func @transform_7(%arg0: i32, %arg1: i32) -> (i32, i32) {
    %c0_i32 = arith.constant 0 : i32
    %c0_i32_0 = arith.constant 0 : i32
    %c0_i32_1 = arith.constant 0 : i32
    return %c0_i32, %c0_i32_0 : i32, i32
  }
  func.func @transform_8(%arg0: i32, %arg1: i32) -> (i32, i32) {
    %c0_i32 = arith.constant 0 : i32
    %c0_i32_0 = arith.constant 0 : i32
    %c0_i32_1 = arith.constant 0 : i32
    return %c0_i32, %c0_i32_0 : i32, i32
  }
  func.func @transform_9(%arg0: i32, %arg1: i32) -> (i32, i32) {
    %c0_i32 = arith.constant 0 : i32
    %c0_i32_0 = arith.constant 0 : i32
    %c0_i32_1 = arith.constant 0 : i32
    return %c0_i32, %c0_i32_0 : i32, i32
  }
  func.func @transform_10(%arg0: i32, %arg1: i32) -> (i32, i32, i32, i32) {
    %c0_i32 = arith.constant 0 : i32
    %c0_i32_0 = arith.constant 0 : i32
    %c0_i32_1 = arith.constant 0 : i32
    return %arg0, %arg1, %c0_i32, %c0_i32_0 : i32, i32, i32, i32
  }
}

</mosaic_0001>

<bundles_post_ra>
// kernel: tpu_custom_call.1
= control target key start
LH: loop header
LB: loop body
LE: loop exit
PB: predicated region body
PF: predicated region fallthrough
CT: control target
= control target key end

     0   :  { %s4533_s0 = inlined_call_operand.hbm [shape: f32[2,4,16,64], index: 0, kind: input, shape index: {}]   ;;  %s4534_s1 = inlined_call_operand.vmem [shape: f32[4,16], index: 1, kind: input, shape index: {}]   ;;  %s4535_s2 = inlined_call_operand.vmem [shape: f32[4,1], index: 2, kind: input, shape index: {}]   ;;  %s4536_s3 = inlined_call_operand.vmem [shape: f32[4,1], index: 3, kind: input, shape index: {}]   ;;  %s4537_s4 = inlined_call_operand.hbm [shape: f32[3,3,3,4,4], index: 4, kind: input, shape index: {}]   ;;  %s4538_s5 = inlined_call_operand.vmem [shape: f32[4,1], index: 5, kind: input, shape index: {}]   ;;  %s4539_s6 = inlined_call_operand.vmem [shape: f32[4,1], index: 6, kind: input, shape index: {}]   ;;  %s4540_s7 = inlined_call_operand.vmem [shape: f32[16,4], index: 7, kind: input, shape index: {}]   ;;  %s4541_s8 = inlined_call_operand.vmem [shape: f32[16,1], index: 8, kind: input, shape index: {}]   ;;  %s4542_s9 = inlined_call_operand.vmem [shape: f32[16,1], index: 9, kind: input, shape index: {}]   ;;  %s4543_s10 = inlined_call_operand.hbm [shape: f32[2,4,16,64], index: 10, kind: output, shape index: {}]  }
   0x1   :  { %4560 = sst [smem:[#allocation20_spill]] %s4537_s4 }
   0x2   :  { %4561 = sst [smem:[#allocation21_spill]] %s4538_s5 }
   0x3   :  { %4562 = sst [smem:[#allocation22_spill]] %s4540_s7 }
   0x4   :  { %4563 = sst [smem:[#allocation23_spill]] %s4542_s9 }
   0x5   :  { %4564 = sst [smem:[#allocation24_spill]] %s4543_s10 }
   0x6   :  { %15 = vsyncpa [#allocation4], 0 }
   0x7   :  { %17 = vsyncpa [#allocation4 + $0x1], 0 }
   0x8   :  { %18 = vsyncpa [#allocation7], 0 }
   0x9   :  { %19 = vsyncpa [#allocation5], 0 }
   0xa   :  { %21 = vsyncpa [#allocation5 + $0x1], 0  ;;  %s3968_s13 = smov 0   ;;  %s3970_s14 = smov 0  }
   0xb   :  { %s3972_s15 = smov 0   ;;  %s3974_s16 = smov 0  }
   0xc   :  { %s3976_s17 = smov 0   ;;  %s3978_s18 = smov 0  }
   0xd   :  { %s3980_s19 = smov 0   ;;  %s3982_s20 = smov 0  }
   0xe   :  { %s3984_s21 = smov 0   ;;  %s3986_s22 = smov 0  }
   0xf   :  { %s3988_s23 = smov 0  }
  0x10 LB: > { %4565 = sst [smem:[#allocation12_spill]] %s3849_s13  ;;  %s3186_s24 = sadd.s32 4294967295, %s3889_s23   ;;  %s3889_s23 = sphi %s3988_s23, %s27_s23   ;;  %s3885_s22 = sphi %s3986_s22, %s4612_s22   ;;  %s3881_s21 = sphi %s3984_s21, %s4611_s21   ;;  %s3877_s20 = sphi %s3982_s20, %s4610_s20   ;;  %s3873_s19 = sphi %s3980_s19, %s4602_s19   ;;  %s3869_s18 = sphi %s3978_s18, %s4609_s18   ;;  %s3865_s17 = sphi %s3976_s17, %s4608_s17   ;;  %s3861_s16 = sphi %s3974_s16, %s4607_s16   ;;  %s3857_s15 = sphi %s3972_s15, %s4606_s15   ;;  %s3853_s14 = sphi %s3970_s14, %s4605_s14   ;;  %s3849_s13 = sphi %s3968_s13, %s4601_s13  }
  0x11   : > { %4566 = sst [smem:[#allocation13_spill]] %s3853_s14  ;;  %s3187_s25 = sadd.s32 4294967294, %s3889_s23  }
  0x12   : > { %4567 = sst [smem:[#allocation14_spill]] %s3877_s20  ;;  %p59_p0 = scmp.ne.s32.totalorder %s3865_s17, %s3861_s16 }
  0x13   : > { %4568 = sst [smem:[#allocation15_spill]] %s3881_s21  ;;  %p4024_p1 = scmp.eq.s32.totalorder %s3186_s24, 0 }
  0x14   : > { %p273_p2 = scmp.ne.s32.totalorder %s3857_s15, %s3853_s14  ;;  %p274_p4 = scmp.eq.s32.totalorder %s3186_s24, 7 }
  0x15   : > { %s4569_s26 = scalar_select %p4024_p1, 1, 0 }
  0x16   : > { %p4033_p3 = por %p4024_p1, %p59_p0  ;;  %p279_p5 = scmp.ne.s32.totalorder %s3853_s14, %s3849_s13 }
  0x17   : > { %p280_p6 = scmp.eq.s32.totalorder %s3187_s25, 7  ;;  %p4039_p7 = por %p274_p4, %p273_p2 }
  0x18   : > { %s4570_s28 = scalar_select %p4033_p3, 1, 0 }
  0x19   : > { %s4571_s29 = scalar_select %p4039_p7, 1, 0 }
  0x1a   : > { %p3188_p8 = scmp.ge.s32.totalorder %s3889_s23, 1  ;;  %p4044_p9 = por %p280_p6, %p279_p5 }
  0x1b   : > { %4572 = sst [smem:[#allocation16_spill]] %s4571_s29  ;;  %p287_p10 = scmp.lt.s32.totalorder %s3889_s23, 9 }
  0x1c   : > { %s4573_s30 = scalar_select %p4044_p9, 1, 0 }
  0x1d   : > { %p4049_p11 = pnand %p3188_p8, %p287_p10  ;;  %s3891_s12 = smov [#allocation6]  }
  0x1e   : > { %4574 = sst [smem:[#allocation17_spill]] %s4573_s30  ;;  %s308_s16 = sshll.u32 %s3891_s12, 4  ;;  %s309_s16 = int_to_ptr.vmem [resolvable:$true] %s308_s16 }
  0x1f   : > { %s4575_s11 = scalar_select %p4049_p11, 1, 0 }
  0x20   : > { %p3579_p12 = pneg %p4049_p11  ;;  %s4577_s4 = sld [smem:[#allocation20_spill]] }
  0x22   : > { %p4057_p13 = pnand %p3579_p12, %p4024_p1 }
  0x24   : > { %p3707_p2 = pneg %p4057_p13 }
  0x26   : > { %s3705_s30 = scalar_lea.hbm %s4577_s4, 1728 }
  0x27   : > { %p3706_p0 = scmp.ne.s32.totalorder %s4577_s4, %s3705_s30  ;;  %p3712_p6 = scmp.lt.u32.totalorder %s3705_s30, %s4577_s4 }
  0x29   : > { %p3708_p4 = pnand %p3707_p2, %p3706_p0 }
  0x2b   : > { %p3709_p5 = pneg %p3708_p4 }
  0x2d   : > { %p3714_p8 = pnand %p3712_p6, %p3709_p5 }
  0x2f   : > { %3717 = shalt.err (!%p3714_p8)
}
  0x30   : > { %s3718_s20 = scalar_lea.vmem %s309_s16, 1728  ;;  %p3726_p7 = scmp.lt.s32.totalorder %s309_s16, %s309_s16 }
  0x31   : > { %p3719_p10 = scmp.ne.s32.totalorder %s309_s16, %s3718_s20  ;;  %p3727_p1 = scmp.lt.s32.totalorder %s3718_s20, %s3718_s20 }
  0x33   : > { %p3721_p12 = pnand %p3719_p10, %p3707_p2  ;;  %p3728_p3 = por %p3727_p1, %p3726_p7 }
  0x35   : > { %p3722_p9 = pneg %p3721_p12 }
  0x37   : > { %p3729_p11 = pnand %p3728_p3, %p3722_p9 }
  0x39   : > { %3732 = shalt.err (!%p3729_p11)
}
  0x3a   : > { %s3892_s10 = smov 64   ;;  %s3893_s13 = smov 4  }
  0x3b   : > { %3582 = dma.hbm_to_vmem [thread:$0]  (!%p4057_p13), %s4577_s4, 1728, %s309_s16, [#allocation7], %s3892_s10, %s3892_s10, %s3893_s13  }
  0x3c   : > { %s36_s20 = sadd.s32 1, %s3881_s21  ;;  %s39_s30 = sadd.s32 1, %s3885_s22 }
  0x3d   : > { %p37_p1 = scmp.ge.s32.totalorder %s36_s20, 4  ;;  %s46_s25 = sadd.s32 1, %s3869_s18 }
  0x3e   : > { %p53_p3 = scmp.ne.s32.totalorder %s3869_s18, %s3865_s17  ;;  %p54_p7 = scmp.eq.s32.totalorder %s3889_s23, 0 }
  0x3f   : > { %s4614_s20 = smov (%p37_p1, %s36_s20), 0  ;;  %s4616_s30 = smov (!%p37_p1, %s39_s30), %s3885_s22 }
  0x40   : > { %4578 = sst [smem:[#allocation18_spill]] %s4614_s20  ;;  %s259_s24 = ssub.s32 %s3881_s21, %s4614_s20 }
  0x41   : > { %p41_p9 = scmp.ge.s32.totalorder %s4616_s30, 2  ;;  %p3592_p11 = scmp.lt.s32.totalorder %s3889_s23, 8 }
  0x42   : > { %p4089_p13 = por %p54_p7, %p53_p3  ;;  %s337_s12 = sand.u32 1, %s3869_s18  }
  0x43   : > { %s4618_s30 = smov (%p41_p9, %s4616_s30), 0  ;;  %s3191_s10 = sshll.u32 %s337_s12, 6 }
  0x44   : > { %4580 = sst [smem:[#allocation19_spill]] %s4618_s30  ;;  %s43_s13 = ssub.s32 %s3885_s22, %s4618_s30 }
  0x45   : > { %p44_p0 = scmp.eq.s32.totalorder %s43_s13, 0  ;;  %s260_s27 = sor.u32 %s259_s24, %s43_s13 }
  0x46   : > { %p261_p2 = scmp.eq.s32.totalorder %s260_s27, 0  ;;  %s3279_s29 = sshll.u32 %s3885_s22, 10 }
  0x47   : > { %s4100_s4 = scalar_select %p44_p0, %s3869_s18, %s46_s25  }
  0x48   : > { %s4581_s20 = sadd.s32 1, %s3857_s15  ;;  %s4110_s5 = scalar_lea.hbm %s4533_s0, %s3279_s29 }
  0x49   : > { %s4105_s21 = scalar_select %p261_p2, %s3857_s15, %s4581_s20  }
  0x4a   : > { %s341_s9 = scalar_lea.vmem [#allocation3], %s3191_s10  ;;  %p4118_p4 = pnand %p3592_p11, %p4089_p13 }
  0x4b   : > { %s348_s30 = sshll.u32 %s341_s9, 4  ;;  %s4122_s20 = scalar_lea.sflag [#allocation4], %s337_s12  ;;  %s4112_s30 = int_to_ptr.vmem [resolvable:$true] %s348_s30 }
  0x4c   : > { %s3733_s7 = scalar_lea.hbm %s4110_s5, 1024  ;;  %p3735_p6 = pneg %p4118_p4 }
  0x4d   : > { %p3734_p5 = scmp.ne.s32.totalorder %s4110_s5, %s3733_s7  ;;  %s3738_s24 = scalar_lea.hbm %s4533_s0, 2048 }
  0x4e   : > { %p3739_p12 = scmp.lt.u32.totalorder %s4110_s5, %s4533_s0  ;;  %p3740_p1 = scmp.lt.u32.totalorder %s3738_s24, %s3733_s7 }
  0x4f   : > { %p3736_p8 = pnand %p3735_p6, %p3734_p5  ;;  %p3742_p7 = scmp.lt.u32.totalorder %s3733_s7, %s4110_s5 }
  0x50   : > { %p3741_p3 = por %p3740_p1, %p3739_p12 }
  0x51   : > { %p3737_p10 = pneg %p3736_p8 }
  0x52   : > { %p3743_p9 = por %p3742_p7, %p3741_p3 }
  0x54   : > { %p3744_p11 = pnand %p3743_p9, %p3737_p10 }
  0x56   : > { %3747 = shalt.err (!%p3744_p11)
}
  0x57   : > { %s3748_s12 = scalar_lea.vmem %s4112_s30, 1024  ;;  %s3894_s13 = smov [#allocation3]  }
  0x58   : > { %p3749_p13 = scmp.ne.s32.totalorder %s4112_s30, %s3748_s12  ;;  %s3753_s27 = sshll.u32 %s3894_s13, 4  ;;  %s3754_s27 = int_to_ptr.vmem [resolvable:$false] %s3753_s27 }
  0x59   : > { %s3755_s29 = scalar_lea.vmem %s3754_s27, 2048  ;;  %p3756_p5 = scmp.lt.s32.totalorder %s4112_s30, %s3754_s27 }
  0x5a   : > { %p3751_p0 = pnand %p3749_p13, %p3735_p6  ;;  %p3757_p8 = scmp.lt.s32.totalorder %s3755_s29, %s3748_s12 }
  0x5c   : > { %p3752_p2 = pneg %p3751_p0  ;;  %p3758_p12 = por %p3757_p8, %p3756_p5 }
  0x5e   : > { %p3759_p1 = pnand %p3758_p12, %p3752_p2 }
  0x60   : > { %3762 = shalt.err (!%p3759_p1)
}
  0x61   : > { %s3895_s7 = smov 128   ;;  %s3896_s9 = smov 8  }
  0x62   : > { %3586 = dma.hbm_to_vmem [thread:$0]  (!%p4118_p4), %s4110_s5, 1024, %s4112_s30, %s4122_s20, %s3895_s7, %s3895_s7, %s3896_s9  }
  0x63   : > { %p4583_p6 = scmp.ne.s32.totalorder %s4575_s11, 0 }
  0x64   : > { %s362_s14 = sand.u32 (!%p4583_p6), 1, %s3865_s17   ;;  %p4584_p10 = scmp.ne.s32.totalorder (!%p4583_p6), %s4570_s28, 0 }
  0x65   : > { %360 = sbr.rel (%p4583_p6) target bundleno = 2085 (0x825), region = 60  ;;  %s3195_s24 = sshll.u32 (!%p4583_p6), %s362_s14, 6 }
  0x66   : > { %s363_s16 = scalar_lea.sflag (!%p4583_p6), [#allocation4], %s362_s14  ;;  %s4153_s10 = scalar_lea.vmem (!%p4583_p6), [#allocation3], %s3195_s24 }
  0x6c   : > { %3836 = dma.done.wait (%p4584_p10), %s363_s16, 1024  }
  0x6d   : > { %3838 = vsyncadd (%p4584_p10), %s363_s16, 4294966272  ;;  %p4585_p3 = scmp.ne.s32.totalorder %s4569_s26, 0 }
  0x6f   : > { %3840 = dma.done.wait (%p4585_p3), [#allocation7], 1728  }
  0x70   : > { %3842 = vsyncadd (%p4585_p3), [#allocation7], 4294965568  ;;  %s4164_s5 = sadd.s32 4294967295, %s3873_s19  ;;  %v3897_v0 = vmov 0.0|0.0   ;;  %vm3898_vm0 = vmmov 0   ;;  %v3899_v1 = vmov 0.0   ;;  %v418_v20 = vlaneseq }
  0x71   : > { %3511 = vmatprep.subr.bf16.mxu0 %v3897_v0  ;;  %p443_p4 = scmp.gt.s32.totalorder %s4164_s5, 0  ;;  %p3199_p7 = scmp.lt.s32.totalorder %s4164_s5, 3  ;;  %3354 = vmatprep.mubr.msk.f32.mxu0 %vm3898_vm0, %v3899_v1  ;;  %v3900_v2 = vmov 0   ;;  %v410_v3 = vld [vmem:[%s4535_s2] sm:$0xf]  ;;  %vm451_vm1 = vcmask 130048  }
  0x72   : > { %3703 = vset.pattern.permute.xlu0 %v3900_v2  ;;  %3419 = vmatprep.subr.mxu1 %v3899_v1  ;;  %v411_v6 = vld [vmem:[%s4536_s3] sm:$0xf]  ;;  %vm434_vm2 = vcmask 68608   ;;  %vm436_vm3 = vcmask 667208   ;;  %p538_p9 = scmp.ge.s32.totalorder %s4164_s5, 0  ;;  %p539_p11 = scmp.lt.s32.totalorder %s4164_s5, 4 }
  0x73   : > { %s444_s26 = scalar_select %p443_p4, %s4164_s5, 0  ;;  %3421 = vmatprep.mubr.msk.f32.mxu1 %vm3898_vm0, %v3899_v1  ;;  %3704 = vset.pattern.permute.xlu1 %v3900_v2  ;;  %v4185_v8 = vld [vmem:[%s4534_s1] sm:$0xf]  ;;  %435 = vst.msk [vmem:[#allocation2] sm:$0xf] %vm434_vm2, %v3899_v1  ;;  %vm550_vm5 = vcmask 592968  }
  0x74   : > { %527 = vperm.xlu0 %3703, %v410_v3   ;;  %437 = vst.msk [vmem:[#allocation2] sm:$0xf] %vm436_vm3, %v3899_v1  ;;  %p540_p13 = pnand %p539_p11, %p538_p9  ;;  %s3901_s7 = smov 9   ;;  %v419_v21 = vand.u32 127, %v418_v20  ;;  %vm566_vm6 = vcmask 1043456   ;;  %vm562_vm8 = vcmask 31744  }
  0x75   : > { %s4620_s26 = smov (!%p3199_p7, %s444_s26), 3  ;;  %s3902_s9 = smov 126   ;;  %v558_v24 = vld [vmem:[#allocation6 + $0x4] sm:$0xf]  ;;  %v556_v29 = vld [vmem:[#allocation6] sm:$0xf] }
  0x76   : > { %s3204_s28 = sshll.u32 %s4620_s26, 4  ;;  %s3903_s14 = smov 127   ;;  %v424_v22 = vand.u32 7, %v419_v21  ;;  %v722_v32 = vld [vmem:[#allocation6 + $0x8] sm:$0xf]  ;;  %vm3064_vm11 = vcmask 523264  }
  0x77   : > { %s448_s25 = scalar_lea.vmem %s4153_s10, %s3204_s28 [#allocation3]  ;;  %s3904_s24 = smov 119   ;;  %v805_v34 = vld [vmem:[#allocation6 + $0xc] sm:$0xf]  ;;  %v884_v37 = vld [vmem:[#allocation6 + $0x10] sm:$0xf] }
  0x78   : > { %v449_v4 = vld [vmem:[%s448_s25] sm:$0xff]  ;;  %v450_v5 = vld [vmem:[%s448_s25 + $0x8] sm:$0xff]  ;;  %533 = vperm.xlu0 %3703, %v411_v6   ;;  %s3206_s29 = scalar_select %p540_p13, 0, 1  ;;  %vm4212_vm7 = vcmp.ge.s32.totalorder %v424_v22, 1  ;;  %vm4225_vm9 = vcmp.le.s32.totalorder %v424_v22, 6 }
  0x79   : > { %v3512_v7 = vpack.c.bf16 %v450_v5, %v449_v4  ;;  %s3905_s16 = smov 120   ;;  %s3906_s5 = smov 112   ;;  %v968_v40 = vld [vmem:[#allocation6 + $0x14] sm:$0xf]  ;;  %v1051_v42 = vld [vmem:[#allocation6 + $0x18] sm:$0xf] }
  0x7a   : > { %v543_v13 = vstv %s3206_s29  ;;  %s3907_s26 = smov 118   ;;  %s3908_s28 = smov 110   ;;  %v1130_v45 = vld [vmem:[#allocation6 + $0x1c] sm:$0xf]  ;;  %v1214_v49 = vld [vmem:[#allocation6 + $0x20] sm:$0xf] }
  0x7b   : > { %3513 = vmatpush3.bf16.msra.mxu0 %v3512_v7  ;;  %vm544_vm4 = vcmp.eq.s32.totalorder %v543_v13, 1  ;;  %s3909_s11 = smov 111   ;;  %s3198_s30 = sshll.u32 %s3873_s19, 4  ;;  %v1373_v58 = vld [vmem:[#allocation6 + $0x24] sm:$0xf] }
  0x7c   : > { %3357 = vmatprep.subr.mxu0 %v3899_v1  ;;  %s439_s25 = scalar_lea.vmem %s4153_s10, %s3198_s30 [#allocation3]  ;;  %s2107_s20 = sadd.s32 1, %s3873_s19  ;;  %v1452_v62 = vld [vmem:[#allocation6 + $0x28] sm:$0xf]  ;;  %v1537_v5 = vld [vmem:[#allocation6 + $0x2c] sm:$0xf] }
  0x7d   : > { %v4276_v47 = vld [vmem:[%s439_s25] sm:$0xff]  ;;  %v4278_v48 = vld [vmem:[%s439_s25 + $0x8] sm:$0xff]  ;;  %p2108_p0 = scmp.gt.s32.totalorder %s2107_s20, 0  ;;  %p3244_p2 = scmp.lt.s32.totalorder %s2107_s20, 3  ;;  %v1699_v21 = vld [vmem:[#allocation6 + $0x34] sm:$0xf] }
  0x7e   : > { %3355 = vmatmul.mubr.msk.f32.vlgmr.msra.gmra.mrb[0].mxu0 %vm451_vm1, %v4185_v8  ;;  %v3515_v50 = vpack.c.bf16 %v4278_v48, %v4276_v47  ;;  %p2189_p5 = scmp.ge.s32.totalorder %s2107_s20, 0  ;;  %p2190_p8 = scmp.lt.s32.totalorder %s2107_s20, 4 }
  0x7f   : > { %3359 = vmatprep.mubr.msk.f32.mxu0 %vm3898_vm0, %v3899_v1  ;;  %s2109_s12 = scalar_select %p2108_p0, %s2107_s20, 0 }
  0x80   : > { %p2191_p12 = pnand %p2190_p8, %p2189_p5  ;;  %s4593_s29 = sld [smem:[#allocation22_spill]] }
  0x81   : > { %s4622_s12 = smov (!%p3244_p2, %s2109_s12), 3  ;;  %s4595_s30 = sld [smem:[#allocation16_spill]] }
  0x82   : > { %s3249_s13 = sshll.u32 %s4622_s12, 4 }
  0x83   : > { %s2113_s27 = scalar_lea.vmem %s4153_s10, %s3249_s13 [#allocation3]  ;;  %s4592_s13 = sld [smem:[#allocation13_spill]] }
  0x84   : > { %v2114_v60 = vld [vmem:[%s2113_s27] sm:$0xff]  ;;  %v2115_v61 = vld [vmem:[%s2113_s27 + $0x8] sm:$0xff]  ;;  %s3251_s10 = scalar_select %p2191_p12, 0, 1 }
  0x85   : > { %v3518_v63 = vpack.c.bf16 %v2115_v61, %v2114_v60  ;;  %v2777_v61 = vld [vmem:[#allocation6 + $0x64] sm:$0xf]  ;;  %s4596_s27 = sld [smem:[#allocation24_spill]] }
  0x87   : > { %p4597_p6 = scmp.ne.s32.totalorder %s4595_s30, 0 }
  0xf3   : > { %v4196_v9 = vpop.permute.xlu0 %527 }
  0xf7   : > { %v4199_v14 = vpop.permute.xlu0 %533 }
 0x151   : > { %v521_v10 = vpop.f32.mrb[0].mxu0 }
 0x152   : > { %v530_v11 = vmul.f32 %v4196_v9, %v521_v10  ;;  %v3356_v12 = vpop.f32.mrb[1].mxu0 }
 0x154   : > { %v536_v15 = vadd.f32 %v4199_v14, %v530_v11 }
 0x156   : > { %v537_v16 = vmax.f32 %v536_v15, 0.0 }
 0x158   : > { %v545_v17 = vsel %vm544_vm4, %v537_v16, 0.0 }
 0x159   : > { %547 = vrot.lane.b32.xlu1 %v545_v17, %s3901_s7 }
 0x1cb   : > { %v548_v18 = vpop.permute.xlu1 %547 }
 0x1cc   : > { %551 = vst.msk [vmem:[#allocation2] sm:$0xf] %vm550_vm5, %v548_v18 }
 0x1d3   : > { %v552_v19 = vld [vmem:[#allocation2] sm:$0xf] }
 0x1d4   : > { %717 = vrot.lane.b32.xlu0 %v552_v19, %s3902_s9  ;;  %560 = vrot.lane.b32.xlu1 %v552_v19, %s3903_s14  ;;  %v555_v26 = vsel %vm4212_vm7, %v552_v19, 0.0 }
 0x1d8   : > { %885 = vrot.lane.b32.xlu0 %v552_v19, %s3904_s24  ;;  %800 = vrot.lane.b32.xlu1 %v552_v19, %s3905_s16 }
 0x1dc   : > { %1046 = vrot.lane.b32.xlu0 %v552_v19, %s3906_s5  ;;  %963 = vrot.lane.b32.xlu1 %v552_v19, %s3907_s26 }
 0x1e0   : > { %1209 = vrot.lane.b32.xlu0 %v552_v19, %s3908_s28  ;;  %1131 = vrot.lane.b32.xlu1 %v552_v19, %s3909_s11 }
 0x246   : > { %v561_v25 = vpop.permute.xlu1 %560  ;;  %v718_v28 = vpop.permute.xlu0 %717 }
 0x247   : > { %3358 = vmatpush3.msk.msra.mxu0 %vm566_vm6, %v561_v25  ;;  %v720_v30 = vsel %vm4225_vm9, %v718_v28, 0.0  ;;  %v1783_v25 = vld [vmem:[#allocation6 + $0x38] sm:$0xf] }
 0x248   : > { %3360 = vmatmul.mubr.msk.f32.vlgmr.msra.gmra.mrb[2].mxu0 %vm562_vm8, %v558_v24  ;;  %3362 = vmatprep.subr.mxu0 %v3899_v1 }
 0x249   : > { %3363 = vmatpush3.msk.msra.mxu0 %vm566_vm6, %v555_v26  ;;  %3364 = vmatprep.mubr.msk.f32.mxu0 %vm3898_vm0, %v3899_v1  ;;  %v413_v26 = vld [vmem:[%s4539_s6] sm:$0xf] }
 0x24a   : > { %3367 = vmatprep.subr.mxu0 %v3899_v1  ;;  %v801_v31 = vpop.permute.xlu1 %800  ;;  %v886_v35 = vpop.permute.xlu0 %885 }
 0x24b   : > { %v803_v33 = vsel %vm4212_vm7, %v801_v31, 0.0 }
 0x24e   : > { %v964_v36 = vpop.permute.xlu1 %963  ;;  %v1047_v39 = vpop.permute.xlu0 %1046 }
 0x24f   : > { %v966_v38 = vsel %vm4225_vm9, %v964_v36, 0.0  ;;  %v1049_v41 = vsel %vm4212_vm7, %v1047_v39, 0.0  ;;  %v2029_v36 = vld [vmem:[#allocation6 + $0x44] sm:$0xf] }
 0x250   : > { %3365 = vmatmul.mubr.msk.f32.vlgmr.msra.gmra.mrb[2].mxu0 %vm562_vm8, %v556_v29  ;;  %v415_v29 = vld [vmem:[%s4541_s8 + $0x8] sm:$0xff] }
 0x251   : > { %3368 = vmatpush3.msk.msra.mxu0 %vm566_vm6, %v720_v30  ;;  %3369 = vmatprep.mubr.msk.f32.mxu0 %vm3898_vm0, %v3899_v1  ;;  %v1866_v30 = vld [vmem:[#allocation6 + $0x3c] sm:$0xf] }
 0x252   : > { %3372 = vmatprep.subr.mxu0 %v3899_v1  ;;  %v1132_v43 = vpop.permute.xlu1 %1131  ;;  %v1210_v44 = vpop.permute.xlu0 %1209 }
 0x253   : > { %v1212_v46 = vsel %vm4225_vm9, %v1210_v44, 0.0 }
 0x258   : > { %3370 = vmatmul.mubr.msk.f32.vlgmr.msra.gmra.mrb[2].mxu0 %vm562_vm8, %v722_v32 }
 0x259   : > { %3373 = vmatpush3.msk.msra.mxu0 %vm566_vm6, %v803_v33  ;;  %3374 = vmatprep.mubr.msk.f32.mxu0 %vm3898_vm0, %v3899_v1 }
 0x25a   : > { %3377 = vmatprep.subr.mxu0 %v3899_v1 }
 0x260   : > { %3375 = vmatmul.mubr.msk.f32.vlgmr.msra.gmra.mrb[2].mxu0 %vm562_vm8, %v805_v34  ;;  %v1945_v34 = vld [vmem:[#allocation6 + $0x40] sm:$0xf] }
 0x261   : > { %3378 = vmatpush3.msk.msra.mxu0 %vm566_vm6, %v886_v35  ;;  %3379 = vmatprep.mubr.msk.f32.mxu0 %vm3898_vm0, %v3899_v1 }
 0x262   : > { %3382 = vmatprep.subr.mxu0 %v3899_v1 }
 0x268   : > { %3380 = vmatmul.mubr.msk.f32.vlgmr.msra.gmra.mrb[2].mxu0 %vm562_vm8, %v884_v37 }
 0x269   : > { %3383 = vmatpush3.msk.msra.mxu0 %vm566_vm6, %v966_v38  ;;  %3384 = vmatprep.mubr.msk.f32.mxu0 %vm3898_vm0, %v3899_v1  ;;  %v2205_v38 = vld [vmem:[#allocation6 + $0x48] sm:$0xf] }
 0x26a   : > { %3387 = vmatprep.subr.mxu0 %v3899_v1 }
 0x270   : > { %3385 = vmatmul.mubr.msk.f32.vlgmr.msra.gmra.mrb[2].mxu0 %vm562_vm8, %v968_v40  ;;  %v414_v40 = vld [vmem:[%s4541_s8] sm:$0xff] }
 0x271   : > { %3388 = vmatpush3.msk.msra.mxu0 %vm566_vm6, %v1049_v41  ;;  %3389 = vmatprep.mubr.msk.f32.mxu0 %vm3898_vm0, %v3899_v1 }
 0x272   : > { %3392 = vmatprep.subr.mxu0 %v3899_v1 }
 0x278   : > { %3390 = vmatmul.mubr.msk.f32.vlgmr.msra.gmra.mrb[2].mxu0 %vm562_vm8, %v1051_v42  ;;  %v2284_v42 = vld [vmem:[#allocation6 + $0x4c] sm:$0xf] }
 0x279   : > { %3393 = vmatpush3.msk.msra.mxu0 %vm566_vm6, %v1132_v43  ;;  %3394 = vmatprep.mubr.msk.f32.mxu0 %vm3898_vm0, %v3899_v1 }
 0x27a   : > { %3397 = vmatprep.subr.mxu0 %v3899_v1 }
 0x280   : > { %3395 = vmatmul.mubr.msk.f32.vlgmr.msra.gmra.mrb[2].mxu0 %vm562_vm8, %v1130_v45 }
 0x281   : > { %3398 = vmatpush3.msk.msra.mxu0 %vm566_vm6, %v1212_v46  ;;  %3399 = vmatprep.mubr.msk.f32.mxu0 %vm3898_vm0, %v3899_v1 }
 0x282   : > { %3514 = vmatprep.subr.bf16.mxu0 %v3897_v0 }
 0x288   : > { %3400 = vmatmul.mubr.msk.f32.vlgmr.msra.gmra.mrb[2].mxu0 %vm562_vm8, %v1214_v49  ;;  %v2369_v49 = vld [vmem:[#allocation6 + $0x50] sm:$0xf] }
 0x289   : > { %3516 = vmatpush3.bf16.msra.mxu0 %v3515_v50  ;;  %3406 = vmatprep.mubr.msk.f32.mxu0 %vm3898_vm0, %v3899_v1 }
 0x28a   : > { %3409 = vmatprep.subr.mxu0 %v3899_v1 }
 0x28c   : > { %3407 = vmatmul.mubr.msk.f32.vlgmr.msra.gmra.mrb[4].mxu0 %vm451_vm1, %v4185_v8 }
 0x28d   : > { %3411 = vmatprep.mubr.msk.f32.mxu0 %vm3898_vm0, %v3899_v1 }
 0x35f   : > { %v1358_v51 = vpop.f32.mrb[4].mxu0 }
 0x360   : > { %v1362_v52 = vmul.f32 %v1358_v51, %v4196_v9  ;;  %v3408_v53 = vpop.f32.mrb[5].mxu0  ;;  %v2452_v51 = vld [vmem:[#allocation6 + $0x54] sm:$0xf] }
 0x362   : > { %v1363_v54 = vadd.f32 %v1362_v52, %v4199_v14 }
 0x364   : > { %v1364_v55 = vmax.f32 %v1363_v54, 0.0  ;;  %v2531_v54 = vld [vmem:[#allocation6 + $0x58] sm:$0xf] }
 0x366   : > { %1366 = vrot.lane.b32.xlu1 %v1364_v55, %s3901_s7 }
 0x3d8   : > { %v1367_v56 = vpop.permute.xlu1 %1366 }
 0x3d9   : > { %1369 = vst.msk [vmem:[#allocation2] sm:$0xf] %vm550_vm5, %v1367_v56 }
 0x3e0   : > { %v1370_v57 = vld [vmem:[#allocation2] sm:$0xf] }
 0x3e1   : > { %1454 = vrot.lane.b32.xlu0 %v1370_v57, %s3903_s14  ;;  %v1371_v59 = vsel %vm4212_vm7, %v1370_v57, 0.0 }
 0x3e2   : > { %3410 = vmatpush3.msk.msra.mxu0 %vm566_vm6, %v1371_v59  ;;  %v2698_v59 = vld [vmem:[#allocation6 + $0x60] sm:$0xf] }
 0x3e3   : > { %3412 = vmatmul.mubr.msk.f32.vlgmr.msra.gmra.mrb[2].mxu0 %vm562_vm8, %v1373_v58  ;;  %3414 = vmatprep.subr.mxu0 %v3899_v1 }
 0x3e4   : > { %3416 = vmatprep.mubr.msk.f32.mxu0 %vm3898_vm0, %v3899_v1 }
 0x3e5   : > { %1532 = vrot.lane.b32.xlu0 %v1370_v57, %s3902_s9 }
 0x3e9   : > { %1700 = vrot.lane.b32.xlu0 %v1370_v57, %s3904_s24 }
 0x3ed   : > { %1861 = vrot.lane.b32.xlu0 %v1370_v57, %s3906_s5 }
 0x3f1   : > { %2024 = vrot.lane.b32.xlu0 %v1370_v57, %s3908_s28 }
 0x453   : > { %v1455_v2 = vpop.permute.xlu0 %1454 }
 0x454   : > { %3415 = vmatpush3.msk.msra.mxu0 %vm566_vm6, %v1455_v2  ;;  %v408_v2 = vld [vmem:[%s4593_s29] sm:$0xff] }
 0x455   : > { %3417 = vmatmul.mubr.msk.f32.vlgmr.msra.gmra.mrb[2].mxu0 %vm562_vm8, %v1452_v62  ;;  %3517 = vmatprep.subr.bf16.mxu0 %v3897_v0 }
 0x456   : > { %3519 = vmatpush3.bf16.msra.mxu0 %v3518_v63  ;;  %3458 = vmatprep.mubr.msk.f32.mxu0 %vm3898_vm0, %v3899_v1  ;;  %v2861_v63 = vld [vmem:[#allocation6 + $0x68] sm:$0xf] }
 0x457   : > { %v1533_v3 = vpop.permute.xlu0 %1532 }
 0x458   : > { %v1535_v4 = vsel %vm4225_vm9, %v1533_v3, 0.0 }
 0x459   : > { %3420 = vmatpush3.msk.msra.mxu1 %vm566_vm6, %v1535_v4  ;;  %3459 = vmatmul.mubr.msk.f32.vlgmr.msra.gmra.mrb[6].mxu0 %vm451_vm1, %v4185_v8  ;;  %v2194_v8 = vstv %s3251_s10 }
 0x45a   : > { %3424 = vmatprep.subr.mxu1 %v3899_v1  ;;  %3422 = vmatmul.mubr.msk.f32.vlgmr.msra.gmra.mrb[0].mxu1 %vm562_vm8, %v1537_v5  ;;  %vm2195_vm10 = vcmp.eq.s32.totalorder %v2194_v8, 1 }
 0x45b   : > { %3426 = vmatprep.mubr.msk.f32.mxu1 %vm3898_vm0, %v3899_v1  ;;  %3508 = vmatprep.mubr.msk.f32.mxu0 %vm562_vm8, %v408_v2 }
 0x528   : > { %v4322_v0 = vpop.f32.mrb[2].mxu0 }
 0x529   : > { %v3418_v6 = vpop.f32.mrb[3].mxu0 }
 0x52c   : > { %v2182_v7 = vpop.f32.mrb[6].mxu0 }
 0x52d   : > { %v2186_v10 = vmul.f32 %v2182_v7, %v4196_v9  ;;  %v3460_v11 = vpop.f32.mrb[7].mxu0  ;;  %v1620_v9 = vld [vmem:[#allocation6 + $0x30] sm:$0xf] }
 0x52e   : > { %v409_v11 = vld [vmem:[%s4593_s29 + $0x8] sm:$0xff] }
 0x52f   : > { %v2187_v12 = vadd.f32 %v2186_v10, %v4199_v14  ;;  %v1701_v14 = vpop.permute.xlu0 %1700 }
 0x531   : > { %v2188_v13 = vmax.f32 %v2187_v12, 0.0 }
 0x533   : > { %v2196_v15 = vsel %vm2195_vm10, %v2188_v13, 0.0  ;;  %v1862_v24 = vpop.permute.xlu0 %1861 }
 0x534   : > { %2198 = vrot.lane.b32.xlu1 %v2196_v15, %s3901_s7  ;;  %v1864_v28 = vsel %vm4212_vm7, %v1862_v24, 0.0  ;;  %s4594_s7 = sld [smem:[#allocation14_spill]] }
 0x537   : > { %v2025_v33 = vpop.permute.xlu0 %2024 }
 0x538   : > { %1615 = vrot.lane.b32.xlu1 %v1370_v57, %s3905_s16  ;;  %v2027_v35 = vsel %vm4225_vm9, %v2025_v33, 0.0 }
 0x53c   : > { %1778 = vrot.lane.b32.xlu1 %v1370_v57, %s3907_s26 }
 0x540   : > { %1946 = vrot.lane.b32.xlu1 %v1370_v57, %s3909_s11  ;;  %v2615_v57 = vld [vmem:[#allocation6 + $0x5c] sm:$0xf] }
 0x5a6   : > { %v2199_v16 = vpop.permute.xlu1 %2198 }
 0x5a7   : > { %2201 = vst.msk [vmem:[#allocation2] sm:$0xf] %vm550_vm5, %v2199_v16 }
 0x5aa   : > { %v1616_v17 = vpop.permute.xlu1 %1615 }
 0x5ab   : > { %v1618_v18 = vsel %vm4212_vm7, %v1616_v17, 0.0 }
 0x5ac   : > { %3425 = vmatpush3.msk.msra.mxu1 %vm566_vm6, %v1618_v18 }
 0x5ad   : > { %3427 = vmatmul.mubr.msk.f32.vlgmr.msra.gmra.mrb[0].mxu1 %vm562_vm8, %v1620_v9  ;;  %3429 = vmatprep.subr.mxu1 %v3899_v1 }
 0x5ae   : > { %3430 = vmatpush3.msk.msra.mxu1 %vm566_vm6, %v1701_v14  ;;  %v2202_v19 = vld [vmem:[#allocation2] sm:$0xf]  ;;  %3431 = vmatprep.mubr.msk.f32.mxu1 %vm3898_vm0, %v3899_v1  ;;  %v1779_v20 = vpop.permute.xlu1 %1778 }
 0x5af   : > { %2364 = vrot.lane.b32.xlu0 %v2202_v19, %s3902_s9  ;;  %2286 = vrot.lane.b32.xlu1 %v2202_v19, %s3903_s14  ;;  %v1781_v22 = vsel %vm4225_vm9, %v1779_v20, 0.0  ;;  %v2203_v37 = vsel %vm4212_vm7, %v2202_v19, 0.0  ;;  %s3910_s14 = smov [#allocation8]  }
 0x5b0   : > { %3434 = vmatprep.subr.mxu1 %v3899_v1 }
 0x5b2   : > { %v1947_v32 = vpop.permute.xlu1 %1946 }
 0x5b3   : > { %2532 = vrot.lane.b32.xlu0 %v2202_v19, %s3904_s24  ;;  %2447 = vrot.lane.b32.xlu1 %v2202_v19, %s3905_s16  ;;  %s404_s24 = sand.u32 1, %s4592_s13  }
 0x5b4   : > { %s3197_s16 = sshll.u32 %s404_s24, 4 }
 0x5b5   : > { %3432 = vmatmul.mubr.msk.f32.vlgmr.msra.gmra.mrb[0].mxu1 %vm562_vm8, %v1699_v21  ;;  %s406_s20 = scalar_lea.vmem [#allocation8], %s3197_s16  ;;  %s3767_s16 = sshll.u32 %s3910_s14, 4  ;;  %s3768_s16 = int_to_ptr.vmem [resolvable:$false] %s3767_s16 }
 0x5b6   : > { %3435 = vmatpush3.msk.msra.mxu1 %vm566_vm6, %v1781_v22  ;;  %3436 = vmatprep.mubr.msk.f32.mxu1 %vm3898_vm0, %v3899_v1  ;;  %s3083_s12 = sshll.u32 %s406_s20, 4  ;;  %s4470_s12 = int_to_ptr.vmem [resolvable:$true] %s3083_s12 }
 0x5b7   : > { %2693 = vrot.lane.b32.xlu0 %v2202_v19, %s3906_s5  ;;  %2610 = vrot.lane.b32.xlu1 %v2202_v19, %s3907_s26  ;;  %s4590_s5 = sld [smem:[#allocation23_spill]]  ;;  %s3274_s26 = sshll.u32 %s3873_s19, 1 }
 0x5b8   : > { %3439 = vmatprep.subr.mxu1 %v3899_v1  ;;  %s3763_s9 = scalar_lea.vmem %s4470_s12, 256  ;;  %p3770_p4 = scmp.lt.s32.totalorder %s4470_s12, %s3768_s16 }
 0x5b9   : > { %p3764_p1 = scmp.ne.s32.totalorder %s4470_s12, %s3763_s9 }
 0x5bb   : > { %2856 = vrot.lane.b32.xlu0 %v2202_v19, %s3908_s28  ;;  %2778 = vrot.lane.b32.xlu1 %v2202_v19, %s3909_s11  ;;  %s4591_s11 = sld [smem:[#allocation21_spill]]  ;;  %s3275_s28 = sshll.u32 %s4594_s7, 3 }
 0x5bc   : > { %s4472_s7 = scalar_lea.sflag [#allocation5], %s404_s24  ;;  %p3765_p10 = pnand %p3764_p1, %p4597_p6 }
 0x5bd   : > { %3437 = vmatmul.mubr.msk.f32.vlgmr.msra.gmra.mrb[0].mxu1 %vm562_vm8, %v1783_v25  ;;  %v417_v31 = vld [vmem:[%s4590_s5 + $0x8] sm:$0xff]  ;;  %v416_v41 = vld [vmem:[%s4590_s5] sm:$0xff] }
 0x5be   : > { %3440 = vmatpush3.msk.msra.mxu1 %vm566_vm6, %v1864_v28  ;;  %3441 = vmatprep.mubr.msk.f32.mxu1 %vm3898_vm0, %v3899_v1  ;;  %p3766_p3 = pneg %p3765_p10 }
 0x5bf   : > { %2947 = vperm.xlu0 %3703, %v413_v26   ;;  %3444 = vmatprep.subr.mxu1 %v3899_v1 }
 0x5c1   : > { %v412_v39 = vld [vmem:[%s4591_s11] sm:$0xf]  ;;  %s3080_s11 = sadd.s32 %s3275_s28, %s3274_s26  ;;  %s3769_s26 = scalar_lea.vmem %s3768_s16, 512 }
 0x5c2   : > { %2941 = vperm.xlu1 %3704, %v412_v39   ;;  %s3276_s25 = sshll.u32 %s3080_s11, 7  ;;  %p3771_p7 = scmp.lt.s32.totalorder %s3769_s26, %s3763_s9 }
 0x5c3   : > { %3043 = vperm.xlu0 %3703, %v415_v29   ;;  %s4468_s10 = scalar_lea.hbm %s4596_s27, %s3276_s25 }
 0x5c4   : > { %p3772_p9 = por %p3771_p7, %p3770_p4 }
 0x5c5   : > { %3442 = vmatmul.mubr.msk.f32.vlgmr.msra.gmra.mrb[0].mxu1 %vm562_vm8, %v1866_v30 }
 0x5c6   : > { %3445 = vmatpush3.msk.msra.mxu1 %vm566_vm6, %v1947_v32  ;;  %3446 = vmatprep.mubr.msk.f32.mxu1 %vm3898_vm0, %v3899_v1  ;;  %p3773_p11 = pnand %p3772_p9, %p3766_p3 }
 0x5c7   : > { %3055 = vperm.xlu0 %3703, %v417_v31   ;;  %3449 = vmatprep.subr.mxu1 %v3899_v1 }
 0x5c8   : > { %3038 = vperm.xlu1 %3704, %v414_v40  }
 0x5cc   : > { %3050 = vperm.xlu1 %3704, %v416_v41  }
 0x5cd   : > { %3447 = vmatmul.mubr.msk.f32.vlgmr.msra.gmra.mrb[0].mxu1 %vm562_vm8, %v1945_v34 }
 0x5ce   : > { %3450 = vmatpush3.msk.msra.mxu1 %vm566_vm6, %v2027_v35  ;;  %3451 = vmatprep.mubr.msk.f32.mxu1 %vm3898_vm0, %v3899_v1 }
 0x5cf   : > { %3461 = vmatprep.subr.mxu1 %v3899_v1 }
 0x5d5   : > { %3452 = vmatmul.mubr.msk.f32.vlgmr.msra.gmra.mrb[0].mxu1 %vm562_vm8, %v2029_v36 }
 0x5d6   : > { %3462 = vmatpush3.msk.msra.mxu1 %vm566_vm6, %v2203_v37  ;;  %3463 = vmatprep.mubr.msk.f32.mxu1 %vm3898_vm0, %v3899_v1 }
 0x5d7   : > { %3466 = vmatprep.subr.mxu1 %v3899_v1 }
 0x5dd   : > { %3464 = vmatmul.mubr.msk.f32.vlgmr.msra.gmra.mrb[0].mxu1 %vm562_vm8, %v2205_v38 }
 0x5de   : > { %3468 = vmatprep.mubr.msk.f32.mxu1 %vm3898_vm0, %v3899_v1 }
 0x621   : > { %v2365_v43 = vpop.permute.xlu0 %2364  ;;  %v2287_v44 = vpop.permute.xlu1 %2286 }
 0x622   : > { %v2367_v45 = vsel %vm4225_vm9, %v2365_v43, 0.0  ;;  %3467 = vmatpush3.msk.msra.mxu1 %vm566_vm6, %v2287_v44 }
 0x623   : > { %3469 = vmatmul.mubr.msk.f32.vlgmr.msra.gmra.mrb[0].mxu1 %vm562_vm8, %v2284_v42  ;;  %3471 = vmatprep.subr.mxu1 %v3899_v1 }
 0x624   : > { %3472 = vmatpush3.msk.msra.mxu1 %vm566_vm6, %v2367_v45  ;;  %3473 = vmatprep.mubr.msk.f32.mxu1 %vm3898_vm0, %v3899_v1 }
 0x625   : > { %3476 = vmatprep.subr.mxu1 %v3899_v1  ;;  %v2448_v46 = vpop.permute.xlu1 %2447  ;;  %v2533_v52 = vpop.permute.xlu0 %2532 }
 0x626   : > { %v2450_v50 = vsel %vm4212_vm7, %v2448_v46, 0.0 }
 0x629   : > { %v2611_v53 = vpop.permute.xlu1 %2610  ;;  %v2694_v56 = vpop.permute.xlu0 %2693 }
 0x62a   : > { %v2613_v55 = vsel %vm4225_vm9, %v2611_v53, 0.0  ;;  %v2696_v58 = vsel %vm4212_vm7, %v2694_v56, 0.0 }
 0x62b   : > { %3474 = vmatmul.mubr.msk.f32.vlgmr.msra.gmra.mrb[0].mxu1 %vm562_vm8, %v2369_v49 }
 0x62c   : > { %3477 = vmatpush3.msk.msra.mxu1 %vm566_vm6, %v2450_v50  ;;  %3478 = vmatprep.mubr.msk.f32.mxu1 %vm3898_vm0, %v3899_v1 }
 0x62d   : > { %3481 = vmatprep.subr.mxu1 %v3899_v1  ;;  %v2779_v60 = vpop.permute.xlu1 %2778  ;;  %v2857_v23 = vpop.permute.xlu0 %2856 }
 0x62e   : > { %v2859_v62 = vsel %vm4225_vm9, %v2857_v23, 0.0 }
 0x633   : > { %3479 = vmatmul.mubr.msk.f32.vlgmr.msra.gmra.mrb[0].mxu1 %vm562_vm8, %v2452_v51 }
 0x634   : > { %3482 = vmatpush3.msk.msra.mxu1 %vm566_vm6, %v2533_v52  ;;  %3483 = vmatprep.mubr.msk.f32.mxu1 %vm3898_vm0, %v3899_v1 }
 0x635   : > { %3486 = vmatprep.subr.mxu1 %v3899_v1 }
 0x63b   : > { %3484 = vmatmul.mubr.msk.f32.vlgmr.msra.gmra.mrb[0].mxu1 %vm562_vm8, %v2531_v54 }
 0x63c   : > { %3487 = vmatpush3.msk.msra.mxu1 %vm566_vm6, %v2613_v55  ;;  %3488 = vmatprep.mubr.msk.f32.mxu1 %vm3898_vm0, %v3899_v1 }
 0x63d   : > { %3491 = vmatprep.subr.mxu1 %v3899_v1 }
 0x63e   : > { %v2948_v7 = vpop.permute.xlu0 %2947 }
 0x641   : > { %v2942_v5 = vpop.permute.xlu1 %2941 }
 0x642   : > { %v3044_v8 = vpop.permute.xlu0 %3043 }
 0x643   : > { %3489 = vmatmul.mubr.msk.f32.vlgmr.msra.gmra.mrb[0].mxu1 %vm562_vm8, %v2615_v57 }
 0x644   : > { %3492 = vmatpush3.msk.msra.mxu1 %vm566_vm6, %v2696_v58  ;;  %3493 = vmatprep.mubr.msk.f32.mxu1 %vm3898_vm0, %v3899_v1 }
 0x645   : > { %3496 = vmatprep.subr.mxu1 %v3899_v1 }
 0x646   : > { %v3056_v16 = vpop.permute.xlu0 %3055 }
 0x64b   : > { %3494 = vmatmul.mubr.msk.f32.vlgmr.msra.gmra.mrb[0].mxu1 %vm562_vm8, %v2698_v59 }
 0x64c   : > { %3497 = vmatpush3.msk.msra.mxu1 %vm566_vm6, %v2779_v60  ;;  %3498 = vmatprep.mubr.msk.f32.mxu1 %vm3898_vm0, %v3899_v1 }
 0x64d   : > { %3501 = vmatprep.subr.mxu1 %v3899_v1 }
 0x653   : > { %3499 = vmatmul.mubr.msk.f32.vlgmr.msra.gmra.mrb[0].mxu1 %vm562_vm8, %v2777_v61 }
 0x654   : > { %3502 = vmatpush3.msk.msra.mxu1 %vm566_vm6, %v2859_v62  ;;  %3503 = vmatprep.mubr.msk.f32.mxu1 %vm3898_vm0, %v3899_v1 }
 0x65b   : > { %3504 = vmatmul.mubr.msk.f32.vlgmr.msra.gmra.mrb[0].mxu1 %vm562_vm8, %v2861_v63 }
 0x72e   : > { %v2934_v3 = vpop.f32.mrb[0].mxu1 }
 0x72f   : > { %v3520_v27 = vadd.f32 %v2934_v3, %v4322_v0  ;;  %v3505_v4 = vpop.f32.mrb[1].mxu1  ;;  %v3039_v0 = vpop.permute.xlu1 %3038 }
 0x731   : > { %v2944_v6 = vmul.f32 %v3520_v27, %v2942_v5 }
 0x733   : > { %v2950_v1 = vadd.f32 %v2948_v7, %v2944_v6  ;;  %v3051_v9 = vpop.permute.xlu1 %3050 }
 0x735   : > { %v2951_v10 = vmax.f32 %v2950_v1, 0.0 }
 0x737   : > { %3506 = vmatprep.subr.msk.mxu0 %vm566_vm6, %v2951_v10 }
 0x738   : > { %3507 = vmatpush3.msk.msra.mxu0 %vm566_vm6, %v2951_v10 }
 0x739   : > { %3509 = vmatmul.mubr.msk.f32.vlgmr.msra.gmra.mrb[8].mxu0 %vm562_vm8, %v409_v11 }
 0x80c   : > { %v3510_v12 = vpop.f32.mrb[8].mxu0 }
 0x80d   : > { %v3047_v13 = vmul.f32 %v3510_v12, %v3044_v8  ;;  %v3027_v15 = vpop.f32.mrb[9].mxu0 }
 0x80e   : > { %v3046_v17 = vmul.f32 %v3039_v0, %v3027_v15 }
 0x80f   : > { %v3059_v18 = vadd.f32 %v3056_v16, %v3047_v13 }
 0x810   : > { %v3058_v14 = vadd.f32 %v3051_v9, %v3046_v17 }
 0x811   : > { %v3061_v19 = vadd.f32 %v3059_v18, %v4278_v48 }
 0x812   : > { %v3060_v20 = vadd.f32 %v3058_v14, %v4276_v47 }
 0x813   : > { %v3063_v21 = vmax.f32 %v3061_v19, 0.0 }
 0x814   : > { %v3062_v22 = vmax.f32 %v3060_v20, 0.0 }
 0x815   : > { %3066 = vst.msk [vmem:[%s406_s20 + $0x8] sm:$0xff] %vm3064_vm11, %v3063_v21 }
 0x816   : > { %3065 = vst.msk [vmem:[%s406_s20] sm:$0xff] %vm3064_vm11, %v3062_v22 }
 0x817   : > { %3776 = shalt.err (!%p3773_p11)
}
 0x818   : > { %s3777_s24 = scalar_lea.hbm %s4468_s10, 256  ;;  %s3781_s25 = scalar_lea.hbm %s4596_s27, 2048 }
 0x819   : > { %p3778_p13 = scmp.ne.s32.totalorder %s4468_s10, %s3777_s24  ;;  %p3782_p5 = scmp.lt.u32.totalorder %s4468_s10, %s4596_s27 }
 0x81a   : > { %p3783_p8 = scmp.lt.u32.totalorder %s3781_s25, %s3777_s24  ;;  %p3785_p1 = scmp.lt.u32.totalorder %s3777_s24, %s4468_s10 }
 0x81b   : > { %p3779_p0 = pnand %p3778_p13, %p4597_p6 }
 0x81c   : > { %p3784_p12 = por %p3783_p8, %p3782_p5 }
 0x81d   : > { %p3780_p2 = pneg %p3779_p0 }
 0x81e   : > { %p3786_p10 = por %p3785_p1, %p3784_p12 }
 0x820   : > { %p3787_p3 = pnand %p3786_p10, %p3780_p2 }
 0x822   : > { %3790 = shalt.err (!%p3787_p3)
}
 0x823   : > { %s3911_s13 = smov 128   ;;  %s3912_s9 = smov 8  }
 0x824   : > { %3577 = dma.vmem_to_hbm [thread:$0]  (%p4597_p6), %s4470_s12, 256, %s4468_s10, %s4472_s7, %s3911_s13, %s3911_s13, %s3912_s9  }
 0x825 PF: > { %s4598_s14 = sld [smem:[#allocation12_spill]]  ;;  %s4599_s16 = sld [smem:[#allocation17_spill]] }
 0x826   : > { %p3594_p4 = scmp.ge.s32.totalorder %s3889_s23, 2 }
 0x82b   : > { %s3098_s26 = sand.u32 1, %s4598_s14   ;;  %p4600_p7 = scmp.ne.s32.totalorder %s4599_s16, 0 }
 0x82c   : > { %s3099_s24 = scalar_lea.sflag [#allocation5], %s3098_s26 }
 0x82d   : > { %p3588_p9 = pnand %p3594_p4, %p4600_p7 }
 0x82f   : > { %3844 = dma.done.wait (!%p3588_p9), %s3099_s24, 256  }
 0x830   : > { %3846 = vsyncadd (!%p3588_p9), %s3099_s24, 4294967040  ;;  %s27_s23 = sadd.s32 1, %s3889_s23   ;;  %s4601_s13 = sld [smem:[#allocation13_spill]] }
 0x831   : > { %p24_p11 = scmp.ge.s32.totalorder %s27_s23, 10   ;;  %s4602_s19 = sld [smem:[#allocation15_spill]] }
 0x832   : > { %s4603_s30 = sld [smem:[#allocation18_spill]]  ;;  %s4604_s12 = sld [smem:[#allocation19_spill]] }
 0x833   : > { %s4605_s14 = smov %s3857_s15  ;;  %s4606_s15 = smov %s4105_s21 }
 0x834   : > { %s4607_s16 = smov %s3865_s17  ;;  %s4608_s17 = smov %s3869_s18 }
 0x835   : > { %s4609_s18 = smov %s4100_s4  ;;  %s4610_s20 = smov %s3885_s22 }
 0x836   :  { %26 = sbr.rel (!%p24_p11) target bundleno = 16 (0x10), region = 138 }
 0x838   : > { %s4611_s21 = smov %s4603_s30  ;;  %s4612_s22 = smov %s4604_s12 }
 0x83d   :  { %3104 = vsyncpa [#allocation4], 1 }
 0x83e   :  { %3106 = vsyncpa [#allocation4 + $0x1], 1 }
 0x83f   :  { %3107 = vsyncpa [#allocation7], 1 }
 0x840   :  { %3108 = vsyncpa [#allocation5], 1 }
 0x841   :  { %3110 = vsyncpa [#allocation5 + $0x1], 1 }

</bundles_post_ra>
